<compile_context>
chip_gen: v5e
topology: v5e:2x2
jax: 0.10.0
libtpu: 0.0.40
codegen_flags: <defaults>
</compile_context>

<pallas_src>
import jax
import jax.numpy as jnp
from jax.experimental import pallas as pl
from jax.experimental.pallas import tpu as pltpu


# ---------------------------------------------------------------------------
# Fused kernel: emb+pos gather -> encoder layer -> BiLSTM@t=0 -> Linear -> sigmoid
# TODO(synk): full pretrained 12-layer multi-head roberta-base cannot be
# reproduced here; a single synthetic single-head encoder layer stands in.
# ---------------------------------------------------------------------------
def _make_trabsa_kernel(*, B, S, H, F, U, Cpad):
    BS = B * S

    # --- static column offsets inside the packed slabs (must match pack_params) ---
    # wh slab (H, 3H + H + F + 8U):
    WQKV = 0                  # [Wq*scale | Wk | Wv]
    WO = 3 * H                # Wo
    W1 = 4 * H                # FFN up
    WIH = 4 * H + F           # [Wih_f | Wih_b]
    # bias slab (1, 9H + F + 10U + 1):
    o = 0
    BQKV = o; o += 3 * H
    BO = o;   o += H
    LN1G = o; o += H
    LN1B = o; o += H
    B1 = o;   o += F
    B2 = o;   o += H
    LN2G = o; o += H
    LN2B = o; o += H
    BFB = o;  o += 8 * U      # [b_f | b_b]  (each = b_ih + b_hh summed)
    WCF = o;  o += U          # classifier weight, forward half (as a row)
    WCB = o;  o += U          # classifier weight, backward half (as a row)
    BC = o;   o += 1          # classifier bias

    def kernel(ids_ref, abias_ref, ew_ref, wh_ref, whh_ref, bias_ref, out_ref):
        f32 = jnp.float32
        bf16 = jnp.bfloat16

        def dense(v, w, b):                     # (N,in)@(in,out) + (1,out), bf16 MXU / f32 acc
            return jnp.dot(v.astype(bf16), w, preferred_element_type=f32) + b

        def layer_norm(v, g, b):
            mu = jnp.mean(v, axis=-1, keepdims=True)
            var = jnp.mean(jnp.square(v - mu), axis=-1, keepdims=True)
            return (v - mu) * jax.lax.rsqrt(var + 1e-5) * g + b

        # ---- token + position embedding as ONE selection matmul -------------
        # slab rows: [0,S) = pos table, [S, S+vocab) = emb table, then zero pad.
        ids = ids_ref[...]                                          # (B,S,1) int32
        col3 = jax.lax.broadcasted_iota(jnp.int32, (B, S, Cpad), 2)
        pos3 = jax.lax.broadcasted_iota(jnp.int32, (B, S, Cpad), 1)
        sel = jnp.where((col3 == ids + S) | (col3 == pos3), 1.0, 0.0)
        sel = sel.reshape(BS, Cpad).astype(bf16)                    # (BS, Cpad)
        x2 = jnp.dot(sel, ew_ref[0:Cpad, :],
                     preferred_element_type=f32)                    # emb[id] + pos[s]

        # ---- fused QKV projection (1/sqrt(H) folded into Wq/bq at pack time) -
        qkv = dense(x2, wh_ref[:, WQKV:WQKV + 3 * H],
                    bias_ref[:, BQKV:BQKV + 3 * H])                 # (BS, 3H)
        q = qkv[:, 0:H]
        k = qkv[:, H:2 * H]
        v = qkv[:, 2 * H:3 * H]

        # ---- single-head attention over the flattened (B*S) axis ------------
        # abias already merges the block-diagonal (same-batch) structure with
        # the key-padding mask: 0 where allowed, -1e9 elsewhere.
        scores = jax.lax.dot_general(
            q.astype(bf16), k.astype(bf16),
            dimension_numbers=(((1,), (1,)), ((), ())),
            preferred_element_type=f32)                             # (BS, BS)
        scores = scores + abias_ref[...]
        scores = scores - jnp.max(scores, axis=-1, keepdims=True)
        p = jnp.exp(scores)
        p = p * pl.reciprocal(jnp.sum(p, axis=-1, keepdims=True), approx=True)
        ctx = jnp.dot(p.astype(bf16), v.astype(bf16),
                      preferred_element_type=f32)                   # (BS, H)

        # ---- residual + LN, FFN, residual + LN -------------------------------
        h1 = layer_norm(x2 + dense(ctx, wh_ref[:, WO:WO + H],
                                   bias_ref[:, BO:BO + H]),
                        bias_ref[:, LN1G:LN1G + H], bias_ref[:, LN1B:LN1B + H])
        # TODO(synk): roberta/PyTorch default GELU is the exact erf form; tanh approx used.
        ff = jax.nn.gelu(dense(h1, wh_ref[:, W1:W1 + F],
                               bias_ref[:, B1:B1 + F]), approximate=True)
        h2 = layer_norm(h1 + dense(ff, ew_ref[Cpad:Cpad + F, :],
                                   bias_ref[:, B2:B2 + H]),
                        bias_ref[:, LN2G:LN2G + H], bias_ref[:, LN2B:LN2B + H])

        # ---- BiLSTM output at t = 0 (lstm_output[:, 0, :]) --------------------
        # Both directions' input projections in one dot: h2 @ [Wih_f | Wih_b].
        gates_x = dense(h2, wh_ref[:, WIH:WIH + 8 * U],
                        bias_ref[:, BFB:BFB + 8 * U])               # (BS, 8U)
        gates_x = gates_x.reshape(B, S, 8 * U)

        # Forward direction: one step from zero state -> h@Whh and f*c vanish
        # (Whh_f provably never affects lstm_output[:,0,:], so it is never DMA'd).
        gf = gates_x[:, 0, 0:4 * U]                                 # (B, 4U)
        sgf = jax.nn.sigmoid(gf)                                    # one EUP push
        tgf = jnp.tanh(gf)                                          # one EUP push
        h_f0 = sgf[:, 3 * U:4 * U] * jnp.tanh(sgf[:, 0:U] * tgf[:, 2 * U:3 * U])

        # Backward direction: full reverse scan (x-projection already hoisted).
        whh_b = whh_ref[...]                                        # (U, 4U) bf16, resident
        h_b = jnp.zeros((B, U), f32)
        c_b = jnp.zeros((B, U), f32)
        # Static unroll: S is small and indices stay compile-time constants.
        # TODO(synk): switch to lax.fori_loop(..., unroll=True) if S is scaled up.
        for t in range(S - 1, -1, -1):
            g = gates_x[:, t, 4 * U:8 * U] + jnp.dot(
                h_b.astype(bf16), whh_b, preferred_element_type=f32)
            sg = jax.nn.sigmoid(g)                                  # whole-slab sigmoid
            tg = jnp.tanh(g)                                        # whole-slab tanh
            c_b = sg[:, U:2 * U] * c_b + sg[:, 0:U] * tg[:, 2 * U:3 * U]
            h_b = sg[:, 3 * U:4 * U] * jnp.tanh(c_b)

        # ---- dropout = identity (eval) -> split classifier (VPU+XLU) -> sigmoid
        logits = (jnp.sum(h_f0 * bias_ref[:, WCF:WCF + U], axis=-1, keepdims=True)
                  + jnp.sum(h_b * bias_ref[:, WCB:WCB + U], axis=-1, keepdims=True)
                  + bias_ref[:, BC:BC + 1])                         # (B, 1)
        # NOTE: (B,1) output forces a masked store; fine at tiny B, make it
        # lane-dense (1, pad(B,128)) at serving batch sizes.
        out_ref[...] = jax.nn.sigmoid(logits).astype(out_ref.dtype)

    return kernel


# ---------------------------------------------------------------------------
# Wrapper
# ---------------------------------------------------------------------------
@jax.jit
def trabsa_forward(input_ids, attention_mask, packed):
    B, S = input_ids.shape
    H = packed['wh'].shape[0]
    U = packed['whh_b'].shape[0]
    F = packed['wh'].shape[1] - 4 * H - 8 * U
    Cpad = packed['ew'].shape[0] - F
    BS = B * S

    # Tiny preprocessing (fused by XLA): reshape ids, build the additive
    # attention bias = block-diagonal(same batch) merged with key-padding mask.
    ids3 = input_ids.reshape(B, S, 1).astype(jnp.int32)
    batch_id = jnp.repeat(jnp.arange(B, dtype=jnp.int32), S)        # (BS,)
    same_batch = batch_id[:, None] == batch_id[None, :]             # (BS, BS)
    key_ok = attention_mask.reshape(1, BS) > 0
    attn_bias = jnp.where(same_batch & key_ok, 0.0, -1e9).astype(jnp.float32)

    kernel = _make_trabsa_kernel(B=B, S=S, H=H, F=F, U=U, Cpad=Cpad)
    vmem = pl.BlockSpec(memory_space=pltpu.MemorySpace.VMEM)
    return pl.pallas_call(
        kernel,
        out_shape=jax.ShapeDtypeStruct((B, 1), jnp.float32),
        in_specs=[vmem] * 6,
        out_specs=vmem,
    )(ids3, attn_bias, packed['ew'], packed['wh'], packed['whh_b'], packed['bias'])


# ---------------------------------------------------------------------------
# Deterministic parameter init (PyTorch-shaped) + one-time packing into slabs
# ---------------------------------------------------------------------------
def init_params(key, vocab=50, S=8, H=32, F=64, U=16):
    keys = jax.random.split(key, 24)
    n = lambda i, shape: (0.02 * jax.random.normal(keys[i], shape)).astype(jnp.float32)

    encoder = (
        n(0, (H, H)), n(1, (1, H)),          # Wq, bq
        n(2, (H, H)), n(3, (1, H)),          # Wk, bk
        n(4, (H, H)), n(5, (1, H)),          # Wv, bv
        n(6, (H, H)), n(7, (1, H)),          # Wo, bo
        jnp.ones((1, H), jnp.float32), jnp.zeros((1, H), jnp.float32),   # LN1
        n(8, (H, F)), n(9, (1, F)),          # FFN W1, b1
        n(10, (F, H)), n(11, (1, H)),        # FFN W2, b2
        jnp.ones((1, H), jnp.float32), jnp.zeros((1, H), jnp.float32),   # LN2
    )
    head = {
        'wih_f': n(12, (H, 4 * U)),
        # Whh_f exists in the PyTorch module but never affects lstm_output[:,0,:]
        # (forward h at t=0 starts from zero state) -> kept only for parity.
        'whh_f': n(13, (U, 4 * U)),
        'b_f':   n(14, (1, 4 * U)),          # represents b_ih + b_hh (summed)
        'wih_b': n(15, (H, 4 * U)),
        'whh_b': n(16, (U, 4 * U)),
        'b_b':   n(17, (1, 4 * U)),
        'wc_f':  n(18, (U, 1)),              # classifier weight, forward half
        'wc_b':  n(19, (U, 1)),              # classifier weight, backward half
        'bc':    n(22, (1, 1)),
    }
    return {'emb': n(20, (vocab, H)), 'pos': n(21, (S, H)),
            'encoder': encoder, 'head': head}


def pack_params(p):
    """One-time packing of all parameters into a few DMA-friendly slabs."""
    (wq, bq, wk, bk, wv, bv, wo, bo, ln1g, ln1b,
     w1, b1, w2, b2, ln2g, ln2b) = p['encoder']
    hd = p['head']
    H = wq.shape[0]
    F = w1.shape[1]
    U = hd['whh_b'].shape[0]
    S = p['pos'].shape[0]
    vocab = p['emb'].shape[0]
    scale = 1.0 / float(H) ** 0.5

    # All weights with H input rows, concatenated along the output dim (bf16).
    wh = jnp.concatenate(
        [wq * scale, wk, wv, wo, w1, hd['wih_f'], hd['wih_b']],
        axis=1).astype(jnp.bfloat16)                               # (H, 4H+F+8U)

    # All bias / LN / classifier vectors in one f32 row.
    bias = jnp.concatenate(
        [bq * scale, bk, bv, bo, ln1g, ln1b, b1, b2, ln2g, ln2b,
         hd['b_f'], hd['b_b'],
         hd['wc_f'].reshape(1, U), hd['wc_b'].reshape(1, U), hd['bc']],
        axis=1).astype(jnp.float32)                                # (1, 9H+F+10U+1)

    # [pos ; emb ; zero pad ; W2] stacked along rows (bf16).
    C = S + vocab
    Cpad = ((C + 15) // 16) * 16                                   # bf16 sublane tile
    ew = jnp.concatenate(
        [p['pos'], p['emb'], jnp.zeros((Cpad - C, H), jnp.float32), w2],
        axis=0).astype(jnp.bfloat16)                               # (Cpad+F, H)

    return {'ew': ew, 'wh': wh,
            'whh_b': hd['whh_b'].astype(jnp.bfloat16),
            'bias': bias}


if __name__ == "__main__":
    B, S, H, F, U, VOCAB = 2, 8, 32, 64, 16, 50

    key = jax.random.PRNGKey(0)
    k_ids, k_params = jax.random.split(key)

    input_ids = jax.random.randint(k_ids, (B, S), 0, VOCAB, dtype=jnp.int32)
    attention_mask = jnp.ones((B, S), jnp.int32).at[1, S - 2:].set(0)  # pad tail of row 1

    params = init_params(k_params, vocab=VOCAB, S=S, H=H, F=F, U=U)
    packed = pack_params(params)

    out = jax.block_until_ready(trabsa_forward(input_ids, attention_mask, packed))

    assert out.shape == (B, 1) and out.dtype == jnp.float32
    assert bool(jnp.all(jnp.isfinite(out))) and bool(jnp.all((out >= 0) & (out <= 1)))
    print("KERNEL_OK")
</pallas_src>

<mosaic_0001>
module attributes {stable_mosaic.version = 11 : i64} {
  func.func @kernel(%arg0: memref<2x8x1xi32, #tpu.memory_space<vmem>>, %arg1: memref<16x16xf32, #tpu.memory_space<vmem>>, %arg2: memref<128x32xbf16, #tpu.memory_space<vmem>>, %arg3: memref<32x320xbf16, #tpu.memory_space<vmem>>, %arg4: memref<16x64xbf16, #tpu.memory_space<vmem>>, %arg5: memref<1x513xf32, #tpu.memory_space<vmem>>, %arg6: memref<2x1xf32, #tpu.memory_space<vmem>>) attributes {dimension_semantics = [], scalar_prefetch = 0 : i64, scratch_operands = 0 : i64, tpu.core_type = #tpu.core_type<tc>} {
    %c0 = arith.constant 0 : index
    %c0_0 = arith.constant 0 : index
    %c0_1 = arith.constant 0 : index
    %0 = vector.load %arg0[%c0, %c0_0, %c0_1] : memref<2x8x1xi32, #tpu.memory_space<vmem>>, vector<2x8x1xi32>
    %1 = tpu.iota {dimensions = array<i32: 2>} : vector<2x8x64xi32>
    %2 = tpu.iota {dimensions = array<i32: 1>} : vector<2x8x64xi32>
    %c8_i32 = arith.constant 8 : i32
    %3 = vector.broadcast %c8_i32 : i32 to vector<2x8x1xi32>
    %4 = arith.addi %0, %3 : vector<2x8x1xi32>
    %5 = vector.broadcast %4 : vector<2x8x1xi32> to vector<2x8x64xi32>
    %6 = arith.cmpi eq, %1, %5 : vector<2x8x64xi32>
    %7 = arith.cmpi eq, %1, %2 : vector<2x8x64xi32>
    %8 = arith.ori %6, %7 : vector<2x8x64xi1>
    %cst = arith.constant 1.000000e+00 : f32
    %cst_2 = arith.constant 0.000000e+00 : f32
    %9 = vector.broadcast %cst : f32 to vector<2x8x64xf32>
    %10 = vector.broadcast %cst_2 : f32 to vector<2x8x64xf32>
    %11 = arith.select %8, %9, %10 : vector<2x8x64xi1>, vector<2x8x64xf32>
    %12 = vector.shape_cast %11 : vector<2x8x64xf32> to vector<16x64xf32>
    %13 = arith.truncf %12 : vector<16x64xf32> to vector<16x64xbf16>
    %c0_3 = arith.constant 0 : index
    %c0_4 = arith.constant 0 : index
    %14 = vector.load %arg2[%c0_3, %c0_4] : memref<128x32xbf16, #tpu.memory_space<vmem>>, vector<64x32xbf16>
    %cst_5 = arith.constant dense<0.000000e+00> : vector<16x32xf32>
    %15 = tpu.matmul %13, %14, %cst_5 {dimension_numbers = #tpu.dot_dimension_numbers<[1], [0], [0], [1], [0, 0, 1, 1], [], []>} : vector<16x64xbf16>, vector<64x32xbf16>, vector<16x32xf32> -> vector<16x32xf32>
    %c0_6 = arith.constant 0 : index
    %c0_7 = arith.constant 0 : index
    %16 = vector.load %arg3[%c0_6, %c0_7] : memref<32x320xbf16, #tpu.memory_space<vmem>>, vector<32x96xbf16>
    %c0_8 = arith.constant 0 : index
    %c0_9 = arith.constant 0 : index
    %17 = vector.load %arg5[%c0_8, %c0_9] : memref<1x513xf32, #tpu.memory_space<vmem>>, vector<1x96xf32>
    %18 = arith.truncf %15 : vector<16x32xf32> to vector<16x32xbf16>
    %cst_10 = arith.constant dense<0.000000e+00> : vector<16x96xf32>
    %19 = tpu.matmul %18, %16, %cst_10 {dimension_numbers = #tpu.dot_dimension_numbers<[1], [0], [0], [1], [0, 0, 1, 1], [], []>} : vector<16x32xbf16>, vector<32x96xbf16>, vector<16x96xf32> -> vector<16x96xf32>
    %20 = vector.broadcast %17 : vector<1x96xf32> to vector<16x96xf32>
    %21 = arith.addf %19, %20 : vector<16x96xf32>
    %22 = vector.extract_strided_slice %21 {offsets = [0, 0], sizes = [16, 32], strides = [1, 1]} : vector<16x96xf32> to vector<16x32xf32>
    %23 = vector.extract_strided_slice %21 {offsets = [0, 32], sizes = [16, 32], strides = [1, 1]} : vector<16x96xf32> to vector<16x32xf32>
    %24 = vector.extract_strided_slice %21 {offsets = [0, 64], sizes = [16, 32], strides = [1, 1]} : vector<16x96xf32> to vector<16x32xf32>
    %25 = arith.truncf %22 : vector<16x32xf32> to vector<16x32xbf16>
    %26 = arith.truncf %23 : vector<16x32xf32> to vector<16x32xbf16>
    %cst_11 = arith.constant dense<0.000000e+00> : vector<16x16xf32>
    %27 = tpu.matmul %25, %26, %cst_11 {dimension_numbers = #tpu.dot_dimension_numbers<[1], [1], [0], [0], [0, 0, 1, 0], [], []>} : vector<16x32xbf16>, vector<16x32xbf16>, vector<16x16xf32> -> vector<16x16xf32>
    %c0_12 = arith.constant 0 : index
    %c0_13 = arith.constant 0 : index
    %28 = vector.load %arg1[%c0_12, %c0_13] : memref<16x16xf32, #tpu.memory_space<vmem>>, vector<16x16xf32>
    %29 = arith.addf %27, %28 : vector<16x16xf32>
    %cst_14 = arith.constant dense<0xFF800000> : vector<16xf32>
    %30 = vector.multi_reduction <maximumf>, %29, %cst_14 [1] : vector<16x16xf32> to vector<16xf32>
    %31 = vector.shape_cast %30 : vector<16xf32> to vector<16x1xf32>
    %32 = vector.broadcast %31 : vector<16x1xf32> to vector<16x16xf32>
    %33 = arith.subf %29, %32 : vector<16x16xf32>
    %34 = math.exp %33 : vector<16x16xf32>
    %cst_15 = arith.constant dense<0.000000e+00> : vector<16xf32>
    %35 = vector.multi_reduction <add>, %34, %cst_15 [1] : vector<16x16xf32> to vector<16xf32>
    %36 = vector.shape_cast %35 : vector<16xf32> to vector<16x1xf32>
    %37 = tpu.reciprocal %36 {approx = true} : vector<16x1xf32> -> vector<16x1xf32>
    %38 = vector.broadcast %37 : vector<16x1xf32> to vector<16x16xf32>
    %39 = arith.mulf %34, %38 : vector<16x16xf32>
    %40 = arith.truncf %39 : vector<16x16xf32> to vector<16x16xbf16>
    %41 = arith.truncf %24 : vector<16x32xf32> to vector<16x32xbf16>
    %cst_16 = arith.constant dense<0.000000e+00> : vector<16x32xf32>
    %42 = tpu.matmul %40, %41, %cst_16 {dimension_numbers = #tpu.dot_dimension_numbers<[1], [0], [0], [1], [0, 0, 1, 1], [], []>} : vector<16x16xbf16>, vector<16x32xbf16>, vector<16x32xf32> -> vector<16x32xf32>
    %c0_17 = arith.constant 0 : index
    %c96 = arith.constant 96 : index
    %43 = vector.load %arg3[%c0_17, %c96] : memref<32x320xbf16, #tpu.memory_space<vmem>>, vector<32x32xbf16>
    %c0_18 = arith.constant 0 : index
    %c96_19 = arith.constant 96 : index
    %44 = vector.load %arg5[%c0_18, %c96_19] : memref<1x513xf32, #tpu.memory_space<vmem>>, vector<1x32xf32>
    %45 = arith.truncf %42 : vector<16x32xf32> to vector<16x32xbf16>
    %cst_20 = arith.constant dense<0.000000e+00> : vector<16x32xf32>
    %46 = tpu.matmul %45, %43, %cst_20 {dimension_numbers = #tpu.dot_dimension_numbers<[1], [0], [0], [1], [0, 0, 1, 1], [], []>} : vector<16x32xbf16>, vector<32x32xbf16>, vector<16x32xf32> -> vector<16x32xf32>
    %47 = vector.broadcast %44 : vector<1x32xf32> to vector<16x32xf32>
    %48 = arith.addf %46, %47 : vector<16x32xf32>
    %49 = arith.addf %15, %48 : vector<16x32xf32>
    %c0_21 = arith.constant 0 : index
    %c128 = arith.constant 128 : index
    %50 = vector.load %arg5[%c0_21, %c128] : memref<1x513xf32, #tpu.memory_space<vmem>>, vector<1x32xf32>
    %c0_22 = arith.constant 0 : index
    %c160 = arith.constant 160 : index
    %51 = vector.load %arg5[%c0_22, %c160] : memref<1x513xf32, #tpu.memory_space<vmem>>, vector<1x32xf32>
    %cst_23 = arith.constant dense<0.000000e+00> : vector<16xf32>
    %52 = vector.multi_reduction <add>, %49, %cst_23 [1] : vector<16x32xf32> to vector<16xf32>
    %53 = vector.shape_cast %52 : vector<16xf32> to vector<16x1xf32>
    %cst_24 = arith.constant 3.200000e+01 : f32
    %54 = vector.broadcast %cst_24 : f32 to vector<16x1xf32>
    %55 = arith.divf %53, %54 : vector<16x1xf32>
    %56 = vector.broadcast %55 : vector<16x1xf32> to vector<16x32xf32>
    %57 = arith.subf %49, %56 : vector<16x32xf32>
    %58 = arith.mulf %57, %57 : vector<16x32xf32>
    %cst_25 = arith.constant dense<0.000000e+00> : vector<16xf32>
    %59 = vector.multi_reduction <add>, %58, %cst_25 [1] : vector<16x32xf32> to vector<16xf32>
    %60 = vector.shape_cast %59 : vector<16xf32> to vector<16x1xf32>
    %cst_26 = arith.constant 3.200000e+01 : f32
    %61 = vector.broadcast %cst_26 : f32 to vector<16x1xf32>
    %62 = arith.divf %60, %61 : vector<16x1xf32>
    %63 = vector.broadcast %55 : vector<16x1xf32> to vector<16x32xf32>
    %64 = arith.subf %49, %63 : vector<16x32xf32>
    %cst_27 = arith.constant 9.99999974E-6 : f32
    %65 = vector.broadcast %cst_27 : f32 to vector<16x1xf32>
    %66 = arith.addf %62, %65 : vector<16x1xf32>
    %67 = math.rsqrt %66 : vector<16x1xf32>
    %68 = vector.broadcast %67 : vector<16x1xf32> to vector<16x32xf32>
    %69 = arith.mulf %64, %68 : vector<16x32xf32>
    %70 = vector.broadcast %50 : vector<1x32xf32> to vector<16x32xf32>
    %71 = arith.mulf %69, %70 : vector<16x32xf32>
    %72 = vector.broadcast %51 : vector<1x32xf32> to vector<16x32xf32>
    %73 = arith.addf %71, %72 : vector<16x32xf32>
    %c0_28 = arith.constant 0 : index
    %c128_29 = arith.constant 128 : index
    %74 = vector.load %arg3[%c0_28, %c128_29] : memref<32x320xbf16, #tpu.memory_space<vmem>>, vector<32x64xbf16>
    %c0_30 = arith.constant 0 : index
    %c192 = arith.constant 192 : index
    %75 = vector.load %arg5[%c0_30, %c192] : memref<1x513xf32, #tpu.memory_space<vmem>>, vector<1x64xf32>
    %76 = arith.truncf %73 : vector<16x32xf32> to vector<16x32xbf16>
    %cst_31 = arith.constant dense<0.000000e+00> : vector<16x64xf32>
    %77 = tpu.matmul %76, %74, %cst_31 {dimension_numbers = #tpu.dot_dimension_numbers<[1], [0], [0], [1], [0, 0, 1, 1], [], []>} : vector<16x32xbf16>, vector<32x64xbf16>, vector<16x64xf32> -> vector<16x64xf32>
    %78 = vector.broadcast %75 : vector<1x64xf32> to vector<16x64xf32>
    %79 = arith.addf %77, %78 : vector<16x64xf32>
    %80 = arith.mulf %79, %79 : vector<16x64xf32>
    %81 = arith.mulf %79, %80 : vector<16x64xf32>
    %cst_32 = arith.constant 4.471500e-02 : f32
    %82 = vector.broadcast %cst_32 : f32 to vector<16x64xf32>
    %83 = arith.mulf %82, %81 : vector<16x64xf32>
    %84 = arith.addf %79, %83 : vector<16x64xf32>
    %cst_33 = arith.constant 0.797884583 : f32
    %85 = vector.broadcast %cst_33 : f32 to vector<16x64xf32>
    %86 = arith.mulf %85, %84 : vector<16x64xf32>
    %87 = math.tanh %86 : vector<16x64xf32>
    %cst_34 = arith.constant 1.000000e+00 : f32
    %88 = vector.broadcast %cst_34 : f32 to vector<16x64xf32>
    %89 = arith.addf %88, %87 : vector<16x64xf32>
    %cst_35 = arith.constant 5.000000e-01 : f32
    %90 = vector.broadcast %cst_35 : f32 to vector<16x64xf32>
    %91 = arith.mulf %90, %89 : vector<16x64xf32>
    %92 = arith.mulf %79, %91 : vector<16x64xf32>
    %c64 = arith.constant 64 : index
    %c0_36 = arith.constant 0 : index
    %93 = vector.load %arg2[%c64, %c0_36] : memref<128x32xbf16, #tpu.memory_space<vmem>>, vector<64x32xbf16>
    %c0_37 = arith.constant 0 : index
    %c256 = arith.constant 256 : index
    %94 = vector.load %arg5[%c0_37, %c256] : memref<1x513xf32, #tpu.memory_space<vmem>>, vector<1x32xf32>
    %95 = arith.truncf %92 : vector<16x64xf32> to vector<16x64xbf16>
    %cst_38 = arith.constant dense<0.000000e+00> : vector<16x32xf32>
    %96 = tpu.matmul %95, %93, %cst_38 {dimension_numbers = #tpu.dot_dimension_numbers<[1], [0], [0], [1], [0, 0, 1, 1], [], []>} : vector<16x64xbf16>, vector<64x32xbf16>, vector<16x32xf32> -> vector<16x32xf32>
    %97 = vector.broadcast %94 : vector<1x32xf32> to vector<16x32xf32>
    %98 = arith.addf %96, %97 : vector<16x32xf32>
    %99 = arith.addf %73, %98 : vector<16x32xf32>
    %c0_39 = arith.constant 0 : index
    %c288 = arith.constant 288 : index
    %100 = vector.load %arg5[%c0_39, %c288] : memref<1x513xf32, #tpu.memory_space<vmem>>, vector<1x32xf32>
    %c0_40 = arith.constant 0 : index
    %c320 = arith.constant 320 : index
    %101 = vector.load %arg5[%c0_40, %c320] : memref<1x513xf32, #tpu.memory_space<vmem>>, vector<1x32xf32>
    %cst_41 = arith.constant dense<0.000000e+00> : vector<16xf32>
    %102 = vector.multi_reduction <add>, %99, %cst_41 [1] : vector<16x32xf32> to vector<16xf32>
    %103 = vector.shape_cast %102 : vector<16xf32> to vector<16x1xf32>
    %cst_42 = arith.constant 3.200000e+01 : f32
    %104 = vector.broadcast %cst_42 : f32 to vector<16x1xf32>
    %105 = arith.divf %103, %104 : vector<16x1xf32>
    %106 = vector.broadcast %105 : vector<16x1xf32> to vector<16x32xf32>
    %107 = arith.subf %99, %106 : vector<16x32xf32>
    %108 = arith.mulf %107, %107 : vector<16x32xf32>
    %cst_43 = arith.constant dense<0.000000e+00> : vector<16xf32>
    %109 = vector.multi_reduction <add>, %108, %cst_43 [1] : vector<16x32xf32> to vector<16xf32>
    %110 = vector.shape_cast %109 : vector<16xf32> to vector<16x1xf32>
    %cst_44 = arith.constant 3.200000e+01 : f32
    %111 = vector.broadcast %cst_44 : f32 to vector<16x1xf32>
    %112 = arith.divf %110, %111 : vector<16x1xf32>
    %113 = vector.broadcast %105 : vector<16x1xf32> to vector<16x32xf32>
    %114 = arith.subf %99, %113 : vector<16x32xf32>
    %cst_45 = arith.constant 9.99999974E-6 : f32
    %115 = vector.broadcast %cst_45 : f32 to vector<16x1xf32>
    %116 = arith.addf %112, %115 : vector<16x1xf32>
    %117 = math.rsqrt %116 : vector<16x1xf32>
    %118 = vector.broadcast %117 : vector<16x1xf32> to vector<16x32xf32>
    %119 = arith.mulf %114, %118 : vector<16x32xf32>
    %120 = vector.broadcast %100 : vector<1x32xf32> to vector<16x32xf32>
    %121 = arith.mulf %119, %120 : vector<16x32xf32>
    %122 = vector.broadcast %101 : vector<1x32xf32> to vector<16x32xf32>
    %123 = arith.addf %121, %122 : vector<16x32xf32>
    %c0_46 = arith.constant 0 : index
    %c192_47 = arith.constant 192 : index
    %124 = vector.load %arg3[%c0_46, %c192_47] : memref<32x320xbf16, #tpu.memory_space<vmem>>, vector<32x128xbf16>
    %c0_48 = arith.constant 0 : index
    %c352 = arith.constant 352 : index
    %125 = vector.load %arg5[%c0_48, %c352] : memref<1x513xf32, #tpu.memory_space<vmem>>, vector<1x128xf32>
    %126 = arith.truncf %123 : vector<16x32xf32> to vector<16x32xbf16>
    %cst_49 = arith.constant dense<0.000000e+00> : vector<16x128xf32>
    %127 = tpu.matmul %126, %124, %cst_49 {dimension_numbers = #tpu.dot_dimension_numbers<[1], [0], [0], [1], [0, 0, 1, 1], [], []>} : vector<16x32xbf16>, vector<32x128xbf16>, vector<16x128xf32> -> vector<16x128xf32>
    %128 = vector.broadcast %125 : vector<1x128xf32> to vector<16x128xf32>
    %129 = arith.addf %127, %128 : vector<16x128xf32>
    %130 = vector.shape_cast %129 : vector<16x128xf32> to vector<2x8x128xf32>
    %131 = vector.extract_strided_slice %130 {offsets = [0, 0, 0], sizes = [2, 1, 64], strides = [1, 1, 1]} : vector<2x8x128xf32> to vector<2x1x64xf32>
    %132 = vector.shape_cast %131 : vector<2x1x64xf32> to vector<2x64xf32>
    %133 = arith.negf %132 : vector<2x64xf32>
    %134 = math.exp %133 : vector<2x64xf32>
    %cst_50 = arith.constant 1.000000e+00 : f32
    %135 = vector.broadcast %cst_50 : f32 to vector<2x64xf32>
    %136 = arith.addf %135, %134 : vector<2x64xf32>
    %137 = arith.divf %135, %136 : vector<2x64xf32>
    %138 = math.tanh %132 : vector<2x64xf32>
    %139 = vector.extract_strided_slice %137 {offsets = [0, 48], sizes = [2, 16], strides = [1, 1]} : vector<2x64xf32> to vector<2x16xf32>
    %140 = vector.extract_strided_slice %137 {offsets = [0, 0], sizes = [2, 16], strides = [1, 1]} : vector<2x64xf32> to vector<2x16xf32>
    %141 = vector.extract_strided_slice %138 {offsets = [0, 32], sizes = [2, 16], strides = [1, 1]} : vector<2x64xf32> to vector<2x16xf32>
    %142 = arith.mulf %140, %141 : vector<2x16xf32>
    %143 = math.tanh %142 : vector<2x16xf32>
    %144 = arith.mulf %139, %143 : vector<2x16xf32>
    %c0_51 = arith.constant 0 : index
    %c0_52 = arith.constant 0 : index
    %145 = vector.load %arg4[%c0_51, %c0_52] : memref<16x64xbf16, #tpu.memory_space<vmem>>, vector<16x64xbf16>
    %cst_53 = arith.constant 0.000000e+00 : f32
    %146 = vector.broadcast %cst_53 : f32 to vector<2x16xf32>
    %cst_54 = arith.constant 0.000000e+00 : f32
    %147 = vector.broadcast %cst_54 : f32 to vector<2x16xf32>
    %148 = vector.extract_strided_slice %130 {offsets = [0, 7, 64], sizes = [2, 1, 64], strides = [1, 1, 1]} : vector<2x8x128xf32> to vector<2x1x64xf32>
    %149 = vector.shape_cast %148 : vector<2x1x64xf32> to vector<2x64xf32>
    %150 = arith.truncf %146 : vector<2x16xf32> to vector<2x16xbf16>
    %cst_55 = arith.constant dense<0.000000e+00> : vector<2x64xf32>
    %151 = tpu.matmul %150, %145, %cst_55 {dimension_numbers = #tpu.dot_dimension_numbers<[1], [0], [0], [1], [0, 0, 1, 1], [], []>} : vector<2x16xbf16>, vector<16x64xbf16>, vector<2x64xf32> -> vector<2x64xf32>
    %152 = arith.addf %149, %151 : vector<2x64xf32>
    %153 = arith.negf %152 : vector<2x64xf32>
    %154 = math.exp %153 : vector<2x64xf32>
    %cst_56 = arith.constant 1.000000e+00 : f32
    %155 = vector.broadcast %cst_56 : f32 to vector<2x64xf32>
    %156 = arith.addf %155, %154 : vector<2x64xf32>
    %157 = arith.divf %155, %156 : vector<2x64xf32>
    %158 = math.tanh %152 : vector<2x64xf32>
    %159 = vector.extract_strided_slice %157 {offsets = [0, 16], sizes = [2, 16], strides = [1, 1]} : vector<2x64xf32> to vector<2x16xf32>
    %160 = arith.mulf %159, %147 : vector<2x16xf32>
    %161 = vector.extract_strided_slice %157 {offsets = [0, 0], sizes = [2, 16], strides = [1, 1]} : vector<2x64xf32> to vector<2x16xf32>
    %162 = vector.extract_strided_slice %158 {offsets = [0, 32], sizes = [2, 16], strides = [1, 1]} : vector<2x64xf32> to vector<2x16xf32>
    %163 = arith.mulf %161, %162 : vector<2x16xf32>
    %164 = arith.addf %160, %163 : vector<2x16xf32>
    %165 = vector.extract_strided_slice %157 {offsets = [0, 48], sizes = [2, 16], strides = [1, 1]} : vector<2x64xf32> to vector<2x16xf32>
    %166 = math.tanh %164 : vector<2x16xf32>
    %167 = arith.mulf %165, %166 : vector<2x16xf32>
    %168 = vector.extract_strided_slice %130 {offsets = [0, 6, 64], sizes = [2, 1, 64], strides = [1, 1, 1]} : vector<2x8x128xf32> to vector<2x1x64xf32>
    %169 = vector.shape_cast %168 : vector<2x1x64xf32> to vector<2x64xf32>
    %170 = arith.truncf %167 : vector<2x16xf32> to vector<2x16xbf16>
    %cst_57 = arith.constant dense<0.000000e+00> : vector<2x64xf32>
    %171 = tpu.matmul %170, %145, %cst_57 {dimension_numbers = #tpu.dot_dimension_numbers<[1], [0], [0], [1], [0, 0, 1, 1], [], []>} : vector<2x16xbf16>, vector<16x64xbf16>, vector<2x64xf32> -> vector<2x64xf32>
    %172 = arith.addf %169, %171 : vector<2x64xf32>
    %173 = arith.negf %172 : vector<2x64xf32>
    %174 = math.exp %173 : vector<2x64xf32>
    %cst_58 = arith.constant 1.000000e+00 : f32
    %175 = vector.broadcast %cst_58 : f32 to vector<2x64xf32>
    %176 = arith.addf %175, %174 : vector<2x64xf32>
    %177 = arith.divf %175, %176 : vector<2x64xf32>
    %178 = math.tanh %172 : vector<2x64xf32>
    %179 = vector.extract_strided_slice %177 {offsets = [0, 16], sizes = [2, 16], strides = [1, 1]} : vector<2x64xf32> to vector<2x16xf32>
    %180 = arith.mulf %179, %164 : vector<2x16xf32>
    %181 = vector.extract_strided_slice %177 {offsets = [0, 0], sizes = [2, 16], strides = [1, 1]} : vector<2x64xf32> to vector<2x16xf32>
    %182 = vector.extract_strided_slice %178 {offsets = [0, 32], sizes = [2, 16], strides = [1, 1]} : vector<2x64xf32> to vector<2x16xf32>
    %183 = arith.mulf %181, %182 : vector<2x16xf32>
    %184 = arith.addf %180, %183 : vector<2x16xf32>
    %185 = vector.extract_strided_slice %177 {offsets = [0, 48], sizes = [2, 16], strides = [1, 1]} : vector<2x64xf32> to vector<2x16xf32>
    %186 = math.tanh %184 : vector<2x16xf32>
    %187 = arith.mulf %185, %186 : vector<2x16xf32>
    %188 = vector.extract_strided_slice %130 {offsets = [0, 5, 64], sizes = [2, 1, 64], strides = [1, 1, 1]} : vector<2x8x128xf32> to vector<2x1x64xf32>
    %189 = vector.shape_cast %188 : vector<2x1x64xf32> to vector<2x64xf32>
    %190 = arith.truncf %187 : vector<2x16xf32> to vector<2x16xbf16>
    %cst_59 = arith.constant dense<0.000000e+00> : vector<2x64xf32>
    %191 = tpu.matmul %190, %145, %cst_59 {dimension_numbers = #tpu.dot_dimension_numbers<[1], [0], [0], [1], [0, 0, 1, 1], [], []>} : vector<2x16xbf16>, vector<16x64xbf16>, vector<2x64xf32> -> vector<2x64xf32>
    %192 = arith.addf %189, %191 : vector<2x64xf32>
    %193 = arith.negf %192 : vector<2x64xf32>
    %194 = math.exp %193 : vector<2x64xf32>
    %cst_60 = arith.constant 1.000000e+00 : f32
    %195 = vector.broadcast %cst_60 : f32 to vector<2x64xf32>
    %196 = arith.addf %195, %194 : vector<2x64xf32>
    %197 = arith.divf %195, %196 : vector<2x64xf32>
    %198 = math.tanh %192 : vector<2x64xf32>
    %199 = vector.extract_strided_slice %197 {offsets = [0, 16], sizes = [2, 16], strides = [1, 1]} : vector<2x64xf32> to vector<2x16xf32>
    %200 = arith.mulf %199, %184 : vector<2x16xf32>
    %201 = vector.extract_strided_slice %197 {offsets = [0, 0], sizes = [2, 16], strides = [1, 1]} : vector<2x64xf32> to vector<2x16xf32>
    %202 = vector.extract_strided_slice %198 {offsets = [0, 32], sizes = [2, 16], strides = [1, 1]} : vector<2x64xf32> to vector<2x16xf32>
    %203 = arith.mulf %201, %202 : vector<2x16xf32>
    %204 = arith.addf %200, %203 : vector<2x16xf32>
    %205 = vector.extract_strided_slice %197 {offsets = [0, 48], sizes = [2, 16], strides = [1, 1]} : vector<2x64xf32> to vector<2x16xf32>
    %206 = math.tanh %204 : vector<2x16xf32>
    %207 = arith.mulf %205, %206 : vector<2x16xf32>
    %208 = vector.extract_strided_slice %130 {offsets = [0, 4, 64], sizes = [2, 1, 64], strides = [1, 1, 1]} : vector<2x8x128xf32> to vector<2x1x64xf32>
    %209 = vector.shape_cast %208 : vector<2x1x64xf32> to vector<2x64xf32>
    %210 = arith.truncf %207 : vector<2x16xf32> to vector<2x16xbf16>
    %cst_61 = arith.constant dense<0.000000e+00> : vector<2x64xf32>
    %211 = tpu.matmul %210, %145, %cst_61 {dimension_numbers = #tpu.dot_dimension_numbers<[1], [0], [0], [1], [0, 0, 1, 1], [], []>} : vector<2x16xbf16>, vector<16x64xbf16>, vector<2x64xf32> -> vector<2x64xf32>
    %212 = arith.addf %209, %211 : vector<2x64xf32>
    %213 = arith.negf %212 : vector<2x64xf32>
    %214 = math.exp %213 : vector<2x64xf32>
    %cst_62 = arith.constant 1.000000e+00 : f32
    %215 = vector.broadcast %cst_62 : f32 to vector<2x64xf32>
    %216 = arith.addf %215, %214 : vector<2x64xf32>
    %217 = arith.divf %215, %216 : vector<2x64xf32>
    %218 = math.tanh %212 : vector<2x64xf32>
    %219 = vector.extract_strided_slice %217 {offsets = [0, 16], sizes = [2, 16], strides = [1, 1]} : vector<2x64xf32> to vector<2x16xf32>
    %220 = arith.mulf %219, %204 : vector<2x16xf32>
    %221 = vector.extract_strided_slice %217 {offsets = [0, 0], sizes = [2, 16], strides = [1, 1]} : vector<2x64xf32> to vector<2x16xf32>
    %222 = vector.extract_strided_slice %218 {offsets = [0, 32], sizes = [2, 16], strides = [1, 1]} : vector<2x64xf32> to vector<2x16xf32>
    %223 = arith.mulf %221, %222 : vector<2x16xf32>
    %224 = arith.addf %220, %223 : vector<2x16xf32>
    %225 = vector.extract_strided_slice %217 {offsets = [0, 48], sizes = [2, 16], strides = [1, 1]} : vector<2x64xf32> to vector<2x16xf32>
    %226 = math.tanh %224 : vector<2x16xf32>
    %227 = arith.mulf %225, %226 : vector<2x16xf32>
    %228 = vector.extract_strided_slice %130 {offsets = [0, 3, 64], sizes = [2, 1, 64], strides = [1, 1, 1]} : vector<2x8x128xf32> to vector<2x1x64xf32>
    %229 = vector.shape_cast %228 : vector<2x1x64xf32> to vector<2x64xf32>
    %230 = arith.truncf %227 : vector<2x16xf32> to vector<2x16xbf16>
    %cst_63 = arith.constant dense<0.000000e+00> : vector<2x64xf32>
    %231 = tpu.matmul %230, %145, %cst_63 {dimension_numbers = #tpu.dot_dimension_numbers<[1], [0], [0], [1], [0, 0, 1, 1], [], []>} : vector<2x16xbf16>, vector<16x64xbf16>, vector<2x64xf32> -> vector<2x64xf32>
    %232 = arith.addf %229, %231 : vector<2x64xf32>
    %233 = arith.negf %232 : vector<2x64xf32>
    %234 = math.exp %233 : vector<2x64xf32>
    %cst_64 = arith.constant 1.000000e+00 : f32
    %235 = vector.broadcast %cst_64 : f32 to vector<2x64xf32>
    %236 = arith.addf %235, %234 : vector<2x64xf32>
    %237 = arith.divf %235, %236 : vector<2x64xf32>
    %238 = math.tanh %232 : vector<2x64xf32>
    %239 = vector.extract_strided_slice %237 {offsets = [0, 16], sizes = [2, 16], strides = [1, 1]} : vector<2x64xf32> to vector<2x16xf32>
    %240 = arith.mulf %239, %224 : vector<2x16xf32>
    %241 = vector.extract_strided_slice %237 {offsets = [0, 0], sizes = [2, 16], strides = [1, 1]} : vector<2x64xf32> to vector<2x16xf32>
    %242 = vector.extract_strided_slice %238 {offsets = [0, 32], sizes = [2, 16], strides = [1, 1]} : vector<2x64xf32> to vector<2x16xf32>
    %243 = arith.mulf %241, %242 : vector<2x16xf32>
    %244 = arith.addf %240, %243 : vector<2x16xf32>
    %245 = vector.extract_strided_slice %237 {offsets = [0, 48], sizes = [2, 16], strides = [1, 1]} : vector<2x64xf32> to vector<2x16xf32>
    %246 = math.tanh %244 : vector<2x16xf32>
    %247 = arith.mulf %245, %246 : vector<2x16xf32>
    %248 = vector.extract_strided_slice %130 {offsets = [0, 2, 64], sizes = [2, 1, 64], strides = [1, 1, 1]} : vector<2x8x128xf32> to vector<2x1x64xf32>
    %249 = vector.shape_cast %248 : vector<2x1x64xf32> to vector<2x64xf32>
    %250 = arith.truncf %247 : vector<2x16xf32> to vector<2x16xbf16>
    %cst_65 = arith.constant dense<0.000000e+00> : vector<2x64xf32>
    %251 = tpu.matmul %250, %145, %cst_65 {dimension_numbers = #tpu.dot_dimension_numbers<[1], [0], [0], [1], [0, 0, 1, 1], [], []>} : vector<2x16xbf16>, vector<16x64xbf16>, vector<2x64xf32> -> vector<2x64xf32>
    %252 = arith.addf %249, %251 : vector<2x64xf32>
    %253 = arith.negf %252 : vector<2x64xf32>
    %254 = math.exp %253 : vector<2x64xf32>
    %cst_66 = arith.constant 1.000000e+00 : f32
    %255 = vector.broadcast %cst_66 : f32 to vector<2x64xf32>
    %256 = arith.addf %255, %254 : vector<2x64xf32>
    %257 = arith.divf %255, %256 : vector<2x64xf32>
    %258 = math.tanh %252 : vector<2x64xf32>
    %259 = vector.extract_strided_slice %257 {offsets = [0, 16], sizes = [2, 16], strides = [1, 1]} : vector<2x64xf32> to vector<2x16xf32>
    %260 = arith.mulf %259, %244 : vector<2x16xf32>
    %261 = vector.extract_strided_slice %257 {offsets = [0, 0], sizes = [2, 16], strides = [1, 1]} : vector<2x64xf32> to vector<2x16xf32>
    %262 = vector.extract_strided_slice %258 {offsets = [0, 32], sizes = [2, 16], strides = [1, 1]} : vector<2x64xf32> to vector<2x16xf32>
    %263 = arith.mulf %261, %262 : vector<2x16xf32>
    %264 = arith.addf %260, %263 : vector<2x16xf32>
    %265 = vector.extract_strided_slice %257 {offsets = [0, 48], sizes = [2, 16], strides = [1, 1]} : vector<2x64xf32> to vector<2x16xf32>
    %266 = math.tanh %264 : vector<2x16xf32>
    %267 = arith.mulf %265, %266 : vector<2x16xf32>
    %268 = vector.extract_strided_slice %130 {offsets = [0, 1, 64], sizes = [2, 1, 64], strides = [1, 1, 1]} : vector<2x8x128xf32> to vector<2x1x64xf32>
    %269 = vector.shape_cast %268 : vector<2x1x64xf32> to vector<2x64xf32>
    %270 = arith.truncf %267 : vector<2x16xf32> to vector<2x16xbf16>
    %cst_67 = arith.constant dense<0.000000e+00> : vector<2x64xf32>
    %271 = tpu.matmul %270, %145, %cst_67 {dimension_numbers = #tpu.dot_dimension_numbers<[1], [0], [0], [1], [0, 0, 1, 1], [], []>} : vector<2x16xbf16>, vector<16x64xbf16>, vector<2x64xf32> -> vector<2x64xf32>
    %272 = arith.addf %269, %271 : vector<2x64xf32>
    %273 = arith.negf %272 : vector<2x64xf32>
    %274 = math.exp %273 : vector<2x64xf32>
    %cst_68 = arith.constant 1.000000e+00 : f32
    %275 = vector.broadcast %cst_68 : f32 to vector<2x64xf32>
    %276 = arith.addf %275, %274 : vector<2x64xf32>
    %277 = arith.divf %275, %276 : vector<2x64xf32>
    %278 = math.tanh %272 : vector<2x64xf32>
    %279 = vector.extract_strided_slice %277 {offsets = [0, 16], sizes = [2, 16], strides = [1, 1]} : vector<2x64xf32> to vector<2x16xf32>
    %280 = arith.mulf %279, %264 : vector<2x16xf32>
    %281 = vector.extract_strided_slice %277 {offsets = [0, 0], sizes = [2, 16], strides = [1, 1]} : vector<2x64xf32> to vector<2x16xf32>
    %282 = vector.extract_strided_slice %278 {offsets = [0, 32], sizes = [2, 16], strides = [1, 1]} : vector<2x64xf32> to vector<2x16xf32>
    %283 = arith.mulf %281, %282 : vector<2x16xf32>
    %284 = arith.addf %280, %283 : vector<2x16xf32>
    %285 = vector.extract_strided_slice %277 {offsets = [0, 48], sizes = [2, 16], strides = [1, 1]} : vector<2x64xf32> to vector<2x16xf32>
    %286 = math.tanh %284 : vector<2x16xf32>
    %287 = arith.mulf %285, %286 : vector<2x16xf32>
    %288 = vector.extract_strided_slice %130 {offsets = [0, 0, 64], sizes = [2, 1, 64], strides = [1, 1, 1]} : vector<2x8x128xf32> to vector<2x1x64xf32>
    %289 = vector.shape_cast %288 : vector<2x1x64xf32> to vector<2x64xf32>
    %290 = arith.truncf %287 : vector<2x16xf32> to vector<2x16xbf16>
    %cst_69 = arith.constant dense<0.000000e+00> : vector<2x64xf32>
    %291 = tpu.matmul %290, %145, %cst_69 {dimension_numbers = #tpu.dot_dimension_numbers<[1], [0], [0], [1], [0, 0, 1, 1], [], []>} : vector<2x16xbf16>, vector<16x64xbf16>, vector<2x64xf32> -> vector<2x64xf32>
    %292 = arith.addf %289, %291 : vector<2x64xf32>
    %293 = arith.negf %292 : vector<2x64xf32>
    %294 = math.exp %293 : vector<2x64xf32>
    %cst_70 = arith.constant 1.000000e+00 : f32
    %295 = vector.broadcast %cst_70 : f32 to vector<2x64xf32>
    %296 = arith.addf %295, %294 : vector<2x64xf32>
    %297 = arith.divf %295, %296 : vector<2x64xf32>
    %298 = math.tanh %292 : vector<2x64xf32>
    %299 = vector.extract_strided_slice %297 {offsets = [0, 16], sizes = [2, 16], strides = [1, 1]} : vector<2x64xf32> to vector<2x16xf32>
    %300 = arith.mulf %299, %284 : vector<2x16xf32>
    %301 = vector.extract_strided_slice %297 {offsets = [0, 0], sizes = [2, 16], strides = [1, 1]} : vector<2x64xf32> to vector<2x16xf32>
    %302 = vector.extract_strided_slice %298 {offsets = [0, 32], sizes = [2, 16], strides = [1, 1]} : vector<2x64xf32> to vector<2x16xf32>
    %303 = arith.mulf %301, %302 : vector<2x16xf32>
    %304 = arith.addf %300, %303 : vector<2x16xf32>
    %305 = vector.extract_strided_slice %297 {offsets = [0, 48], sizes = [2, 16], strides = [1, 1]} : vector<2x64xf32> to vector<2x16xf32>
    %306 = math.tanh %304 : vector<2x16xf32>
    %307 = arith.mulf %305, %306 : vector<2x16xf32>
    %c0_71 = arith.constant 0 : index
    %c480 = arith.constant 480 : index
    %308 = vector.load %arg5[%c0_71, %c480] : memref<1x513xf32, #tpu.memory_space<vmem>>, vector<1x16xf32>
    %309 = vector.broadcast %308 : vector<1x16xf32> to vector<2x16xf32>
    %310 = arith.mulf %144, %309 : vector<2x16xf32>
    %cst_72 = arith.constant dense<0.000000e+00> : vector<2xf32>
    %311 = vector.multi_reduction <add>, %310, %cst_72 [1] : vector<2x16xf32> to vector<2xf32>
    %312 = vector.shape_cast %311 : vector<2xf32> to vector<2x1xf32>
    %c0_73 = arith.constant 0 : index
    %c496 = arith.constant 496 : index
    %313 = vector.load %arg5[%c0_73, %c496] : memref<1x513xf32, #tpu.memory_space<vmem>>, vector<1x16xf32>
    %314 = vector.broadcast %313 : vector<1x16xf32> to vector<2x16xf32>
    %315 = arith.mulf %307, %314 : vector<2x16xf32>
    %cst_74 = arith.constant dense<0.000000e+00> : vector<2xf32>
    %316 = vector.multi_reduction <add>, %315, %cst_74 [1] : vector<2x16xf32> to vector<2xf32>
    %317 = vector.shape_cast %316 : vector<2xf32> to vector<2x1xf32>
    %318 = arith.addf %312, %317 : vector<2x1xf32>
    %c0_75 = arith.constant 0 : index
    %c512 = arith.constant 512 : index
    %319 = vector.load %arg5[%c0_75, %c512] : memref<1x513xf32, #tpu.memory_space<vmem>>, vector<1x1xf32>
    %320 = vector.broadcast %319 : vector<1x1xf32> to vector<2x1xf32>
    %321 = arith.addf %318, %320 : vector<2x1xf32>
    %322 = arith.negf %321 : vector<2x1xf32>
    %323 = math.exp %322 : vector<2x1xf32>
    %cst_76 = arith.constant 1.000000e+00 : f32
    %324 = vector.broadcast %cst_76 : f32 to vector<2x1xf32>
    %325 = arith.addf %324, %323 : vector<2x1xf32>
    %326 = arith.divf %324, %325 : vector<2x1xf32>
    %c0_77 = arith.constant 0 : index
    %c0_78 = arith.constant 0 : index
    %327 = vector.load %arg6[%c0_77, %c0_78] : memref<2x1xf32, #tpu.memory_space<vmem>>, vector<2x1xf32>
    tpu.vector_store %arg6[%c0_77, %c0_78], %326 {strides = array<i32>} : memref<2x1xf32, #tpu.memory_space<vmem>>, vector<2x1xf32>,
    return
  }
}

</mosaic_0001>

<bundles_post_ra>
// kernel: eq.8
= control target key start
LH: loop header
LB: loop body
LE: loop exit
PB: predicated region body
PF: predicated region fallthrough
CT: control target
= control target key end

     0   :  { %vm7_vm0 = vcmask 64512   ;;  %vm13_vm1 = vcmask 130112   ;;  %s39_s0 = inlined_call_operand.vmem [shape: s32[2,8], index: 0, kind: input, shape index: {}]   ;;  %s40_s1 = inlined_call_operand.vmem [shape: s32[16], index: 1, kind: output, shape index: {}]  }
   0x1   :  { %v4_v0 = vld [vmem:[%s39_s0] sm:$0x3]  ;;  %s22_s0 = smov 8  }
   0x2   :  { %5 = vst [vmem:[#allocation1] sm:$0x3] %v4_v0 }
   0x9   :  { %v10_v1 = vld [vmem:[#allocation1 + $0x1] sm:$0x1]   ;;  %v6_v2 = vld [vmem:[#allocation1] sm:$0x1]  }
   0xa   :  { %11 = vrot.lane.b32.xlu0 %v10_v1, %s22_s0  ;;  %8 = vst.msk [vmem:[#allocation0] sm:$0x1] %vm7_vm0, %v6_v2  }
  0x7c   :  { %v12_v3 = vpop.permute.xlu0 %11  }
  0x7d   :  { %14 = vst.msk [vmem:[#allocation0] sm:$0x1] %vm13_vm1, %v12_v3  }
  0x84   :  { %v17_v4 = vld [vmem:[#allocation0] sm:$0x1] }
  0x85   :  { %20 = vst [vmem:[%s40_s1] sm:$0x1] %v17_v4 }

// kernel: trabsa_forward.1
= control target key start
LH: loop header
LB: loop body
LE: loop exit
PB: predicated region body
PF: predicated region fallthrough
CT: control target
= control target key end

     0   :  { %v1891_v0 = vmov 0   ;;  %v26_v9 = vlaneseq  ;;  %v1892_v14 = vmov 0.0   ;;  %vm78_vm5 = vcmask 523264   ;;  %s1893_s18 = smov 96   ;;  %s1895_s23 = smov 64   ;;  %s2307_s0 = inlined_call_operand.vmem [shape: s32[2,8,1], index: 0, kind: input, shape index: {}]   ;;  %s2308_s2 = inlined_call_operand.vmem [shape: bf16[128,32], index: 2, kind: input, shape index: {}]   ;;  %s2309_s5 = inlined_call_operand.vmem [shape: f32[1,513], index: 5, kind: input, shape index: {}]   ;;  %s2310_s3 = inlined_call_operand.vmem [shape: bf16[32,320], index: 3, kind: input, shape index: {}]   ;;  %s2311_s1 = inlined_call_operand.vmem [shape: f32[16,16], index: 1, kind: input, shape index: {}]   ;;  %s2312_s4 = inlined_call_operand.vmem [shape: bf16[16,64], index: 4, kind: input, shape index: {}]   ;;  %s2313_s6 = inlined_call_operand.vmem [shape: f32[2,1], index: 6, kind: output, shape index: {}]  }
   0x1   :  { %1715 = vset.pattern.permute.xlu0 %v1891_v0  ;;  %v24_v1 = vld [vmem:[%s2307_s0] sm:$0xff]  ;;  %v1692_v2 = vld [vmem:[%s2308_s2 + $0x18] sm:$0xff]  ;;  %v25_v4 = vld [vmem:[%s2307_s0 + $0x8] sm:$0xff]  ;;  %vm117_vm6 = vcmask 261120   ;;  %vm161_vm7 = vcmask 130048   ;;  %s1899_s15 = smov 80  }
   0x2   :  { %v30_v3 = vadd.s32 8, %v24_v1  ;;  %86 = vmatpush.bf16.msra.mxu0 %v1692_v2  ;;  %v31_v5 = vadd.s32 8, %v25_v4  ;;  %v1691_v6 = vld [vmem:[%s2308_s2 + $0x10] sm:$0xff]  ;;  %v1690_v7 = vld [vmem:[%s2308_s2 + $0x8] sm:$0xff]  ;;  %v1689_v8 = vld [vmem:[%s2308_s2] sm:$0xff]  ;;  %v27_v11 = vand.u32 127, %v26_v9 }
   0x3   :  { %v29_v12 = vshrl.u32 %v26_v9, 7  ;;  %v1610_v18 = vld [vmem:[%s2310_s3 + $0x18] sm:$0xf]  ;;  %v1694_v19 = vld [vmem:[%s2310_s3 + $0x20] sm:$0xf0]  ;;  %v137_v39 = vld [vmem:[%s2311_s1 + $0x8] sm:$0xff] }
   0x4   :  { %33 = vperm.xlu0 %1715, %v30_v3   ;;  %v1611_v20 = vor.u32 %v1694_v19, %v1610_v18  ;;  %v1606_v21 = vld [vmem:[%s2310_s3] sm:$0xf]  ;;  %v1693_v22 = vld [vmem:[%s2310_s3 + $0x8] sm:$0xf0] }
   0x5   :  { %vm40_vm0 = vcmp.eq.s32.totalorder %v27_v11, %v29_v12  ;;  %v1607_v23 = vor.u32 %v1693_v22, %v1606_v21  ;;  %v1716_v28 = vld [vmem:[%s2309_s5] ss:$0 sm:$0xff]  ;;  %v1896_v12 = vmov 32.0  }
   0x6   :  { %87 = vmatpush.bf16.msra.mxu0 %v1691_v6  ;;  %127 = vmatpush.bf16.msra.mxu1 %v1611_v20  ;;  %v136_v35 = vld [vmem:[%s2311_s1] sm:$0xff]  ;;  %s1894_s1 = smov 32  }
   0xa   :  { %88 = vmatpush.bf16.msra.mxu0 %v1690_v7  ;;  %128 = vmatpush.bf16.msra.mxu1 %v1607_v23 }
   0xc   :  { %36 = vperm.xlu0 %1715, %v31_v5  }
   0xe   :  { %89 = vmatpush.bf16.msra.mxu0 %v1689_v8 }
  0x76   :  { %v34_v10 = vpop.permute.xlu0 %33 }
  0x77   :  { %vm38_vm1 = vcmp.eq.s32.totalorder %v27_v11, %v34_v10 }
  0x78   :  { %vm41_vm2 = vmor %vm38_vm1, %vm40_vm0 }
  0x79   :  { %v43_v15 = vsel %vm41_vm2, 1.0, %v1892_v14 }
  0x7e   :  { %v37_v13 = vpop.permute.xlu0 %36 }
  0x7f   :  { %vm39_vm3 = vcmp.eq.s32.totalorder %v27_v11, %v37_v13 }
  0x80   :  { %vm42_vm4 = vmor %vm39_vm3, %vm40_vm0 }
  0x81   :  { %v44_v16 = vsel %vm42_vm4, 1.0, %v1892_v14 }
  0x82   :  { %v45_v17 = vpack.c.bf16 %v44_v16, %v43_v15  ;;  %v1717_v15 = vld [vmem:[%s2309_s5 + $0x1] ss:$0 sm:$0xff] }
  0x84   :  { %1603 = vmatmul.msk.bf16.vlgmr.msra.gmra.mxu0 %vm78_vm5, %v45_v17 }
 0x101   :  { %v1967_v24 = vpop.f32.mrf.mxu0 }
 0x109   :  { %v1969_v25 = vpop.f32.mrf.mxu0 }
 0x10a   :  { %v101_v26 = vpack.c.bf16 %v1969_v25, %v1967_v24 }
 0x10c   :  { %1612 = vmatmul.msk.bf16.vlgmr.msra.gmra.mxu1 %vm117_vm6, %v101_v26 }
 0x189   :  { %v130_v27 = vpop.f32.mrf.mxu1 }
 0x18a   :  { %v131_v30 = vadd.f32 %v1716_v28, %v130_v27 }
 0x191   :  { %v132_v29 = vpop.f32.mrf.mxu1 }
 0x192   :  { %v133_v31 = vadd.f32 %v1716_v28, %v132_v29 }
 0x194   :  { %v135_v32 = vpack.c.bf16 %v133_v31, %v131_v30  ;;  %v1622_v30 = vld [vmem:[%s2310_s3 + $0x1c] sm:$0xf]  ;;  %v1696_v31 = vld [vmem:[%s2310_s3 + $0x24] sm:$0xf0] }
 0x196   :  { %139 = vrot.lane.b32.xlu1 %v135_v32, %s1893_s18 }
 0x208   :  { %v140_v33 = vpop.permute.xlu1 %139 }
 0x209   :  { %v145_v34 = vsel %vm117_vm6, %v140_v33, 0 }
 0x20a   :  { %154 = vmatpush.bf16.xpose.msra.mxu2 %v145_v34 }
 0x211   :  { %1613 = vmatmul.msk.bf16.vlgmr.msra.gmra.mxu2 %vm117_vm6, %v135_v32 }
 0x294   :  { %v156_v36 = vpop.f32.mrf.mxu2 }
 0x295   :  { %v157_v37 = vadd.f32 %v156_v36, %v136_v35  ;;  %v1618_v35 = vld [vmem:[%s2310_s3 + $0x4] sm:$0xf]  ;;  %v1695_v36 = vld [vmem:[%s2310_s3 + $0xc] sm:$0xf0] }
 0x297   :  { %v162_v38 = vsel %vm161_vm7, %v157_v37, -inf }
 0x298   :  { %163 = vmax.xlane.f32.xlu1 %v162_v38 }
 0x29c   :  { %v158_v40 = vpop.f32.mrf.mxu2 }
 0x29d   :  { %v159_v41 = vadd.f32 %v158_v40, %v137_v39 }
 0x29f   :  { %v165_v42 = vsel %vm161_vm7, %v159_v41, -inf }
 0x2a0   :  { %166 = vmax.xlane.f32.xlu2 %v165_v42 }
 0x2b1   :  { %212 = vrot.lane.b32.xlu1 %v1716_v28, %s1894_s1 }
 0x2b9   :  { %291 = vrot.lane.b32.xlu1 %v1717_v15, %s1893_s18 }
 0x30b   :  { %v164_v43 = vpop.xlane.xlu1 %163 }
 0x30c   :  { %v168_v44 = vsub.f32 %v157_v37, %v164_v43  ;;  %v1619_v37 = vor.u32 %v1695_v36, %v1618_v35 }
 0x30e   :  { %v170_v45 = vmul.f32 1.442695, %v168_v44 }
 0x310   :  { %1721 = vpow2.f32 %v170_v45 }
 0x313   :  { %v167_v46 = vpop.xlane.xlu2 %166 }
 0x314   :  { %v169_v47 = vsub.f32 %v159_v41, %v167_v46 }
 0x316   :  { %v1722_v48 = vpop.eup %1721  ;;  %v172_v49 = vmul.f32 1.442695, %v169_v47 }
 0x317   :  { %v174_v50 = vsel %vm161_vm7, %v1722_v48, 0.0 }
 0x318   :  { %1723 = vpow2.f32 %v172_v49  ;;  %175 = vadd.xlane.f32.xlu2 %v174_v50 }
 0x31e   :  { %v1724_v51 = vpop.eup %1723 }
 0x31f   :  { %v177_v52 = vsel %vm161_vm7, %v1724_v51, 0.0 }
 0x320   :  { %178 = vadd.xlane.f32.xlu0 %v177_v52 }
 0x323   :  { %v213_v3 = vpop.permute.xlu1 %212 }
 0x330   :  { %185 = vrot.lane.b32.xlu2 %v135_v32, %s1895_s23  ;;  %v1623_v32 = vor.u32 %v1696_v31, %v1622_v30 }
 0x332   :  { %325 = vmatpush.bf16.msrb.mxu1 %v1623_v32 }
 0x336   :  { %326 = vmatpush.bf16.msrb.mxu1 %v1619_v37 }
 0x338   :  { %208 = vrot.lane.b32.xlu2 %v1611_v20, %s1894_s1 }
 0x340   :  { %206 = vrot.lane.b32.xlu2 %v1607_v23, %s1894_s1 }
 0x38b   :  { %v176_v53 = vpop.xlane.xlu2 %175 }
 0x38c   :  { %1725 = vrcp.f32 %v176_v53 }
 0x392   :  { %v1726_v56 = vpop.eup %1725 }
 0x393   :  { %v179_v54 = vpop.xlane.xlu0 %178  ;;  %v186_v55 = vpop.permute.xlu2 %185  ;;  %v182_v58 = vmul.f32 %v1726_v56, %v1722_v48 }
 0x394   :  { %1727 = vrcp.f32 %v179_v54  ;;  %198 = vmatpush.bf16.msra.mxu3 %v186_v55 }
 0x395   :  { %1729 = vrcp.f32 %v1896_v12 }
 0x39a   :  { %v1728_v57 = vpop.eup %1727 }
 0x39b   :  { %v183_v59 = vmul.f32 %v1728_v57, %v1724_v51  ;;  %v209_v60 = vpop.permute.xlu2 %208  ;;  %v1730_v13 = vpop.eup %1729 }
 0x39c   :  { %224 = vmatpush.bf16.msrb.mxu3 %v209_v60  ;;  %v242_v14 = vmul.f32 32.0, %v1730_v13  ;;  %vm246_vm8 = vweird.f32 %v1730_v13 }
 0x39d   :  { %v184_v61 = vpack.c.bf16 %v183_v59, %v182_v58  ;;  %v292_v59 = vpop.permute.xlu1 %291 }
 0x39e   :  { %v243_v16 = vsub.f32 1.0, %v242_v14 }
 0x39f   :  { %1614 = vmatmul.msk.bf16.vlgmr.msra.gmra.mxu3 %vm161_vm7, %v184_v61 }
 0x3a0   :  { %v244_v17 = vmul.f32 %v1730_v13, %v243_v16 }
 0x3a2   :  { %v245_v18 = vadd.f32 %v1730_v13, %v244_v17 }
 0x3a3   :  { %v207_v62 = vpop.permute.xlu2 %206 }
 0x3a4   :  { %225 = vmatpush.bf16.msrb.mxu3 %v207_v62  ;;  %v2004_v19 = vsel %vm246_vm8, %v1730_v13, %v245_v18 }
 0x422   :  { %v200_v63 = vpop.f32.mrf.mxu3 }
 0x42a   :  { %v202_v1 = vpop.f32.mrf.mxu3 }
 0x42b   :  { %v205_v2 = vpack.c.bf16 %v202_v1, %v200_v63  ;;  %v1700_v1 = vld [vmem:[%s2308_s2 + $0x38] sm:$0xff] }
 0x42c   :  { %395 = vmatpush.bf16.msrb.mxu2 %v1700_v1 }
 0x42d   :  { %1615 = vmatmul.msk.bf16.vlgmr.msrb.gmra.mxu3 %vm117_vm6, %v205_v2  ;;  %v1699_v2 = vld [vmem:[%s2308_s2 + $0x30] sm:$0xff] }
 0x430   :  { %396 = vmatpush.bf16.msrb.mxu2 %v1699_v2 }
 0x4b0   :  { %v227_v4 = vpop.f32.mrf.mxu3 }
 0x4b1   :  { %v228_v5 = vadd.f32 %v227_v4, %v213_v3 }
 0x4b3   :  { %v232_v6 = vadd.f32 %v228_v5, %v1967_v24  ;;  %v1697_v5 = vld [vmem:[%s2308_s2 + $0x20] sm:$0xff] }
 0x4b5   :  { %v235_v7 = vsel %vm117_vm6, %v232_v6, 0.0 }
 0x4b6   :  { %236 = vadd.xlane.f32.xlu2 %v235_v7 }
 0x4b8   :  { %v229_v8 = vpop.f32.mrf.mxu3 }
 0x4b9   :  { %v230_v9 = vadd.f32 %v229_v8, %v213_v3  ;;  %v1698_v3 = vld [vmem:[%s2308_s2 + $0x28] sm:$0xff] }
 0x4ba   :  { %397 = vmatpush.bf16.msrb.mxu2 %v1698_v3 }
 0x4bb   :  { %v233_v10 = vadd.f32 %v230_v9, %v1969_v25  ;;  %v1652_v9 = vld [vmem:[%s2310_s3 + $0x1c] sm:$0xf] }
 0x4bd   :  { %v238_v11 = vsel %vm117_vm6, %v233_v10, 0.0 }
 0x4be   :  { %239 = vadd.xlane.f32.xlu0 %v238_v11  ;;  %398 = vmatpush.bf16.msrb.mxu2 %v1697_v5 }
 0x529   :  { %v237_v20 = vpop.xlane.xlu2 %236 }
 0x52a   :  { %v248_v21 = vmul.f32 %v2004_v19, %v237_v20 }
 0x52c   :  { %v250_v22 = vsub.f32 %v232_v6, %v248_v21 }
 0x52e   :  { %v252_v23 = vmul.f32 %v250_v22, %v250_v22 }
 0x530   :  { %v254_v24 = vsel %vm117_vm6, %v252_v23, 0.0 }
 0x531   :  { %v240_v25 = vpop.xlane.xlu0 %239  ;;  %255 = vadd.xlane.f32.xlu0 %v254_v24 }
 0x532   :  { %v249_v26 = vmul.f32 %v2004_v19, %v240_v25 }
 0x534   :  { %v251_v27 = vsub.f32 %v233_v10, %v249_v26  ;;  %v1704_v10 = vld [vmem:[%s2310_s3 + $0x24] sm:$0xf0] }
 0x535   :  { %v1653_v12 = vor.u32 %v1704_v10, %v1652_v9 }
 0x536   :  { %v253_v28 = vmul.f32 %v251_v27, %v251_v27 }
 0x537   :  { %490 = vrot.lane.b32.xlu2 %v1653_v12, %s1895_s23 }
 0x538   :  { %v257_v29 = vsel %vm117_vm6, %v253_v28, 0.0 }
 0x539   :  { %258 = vadd.xlane.f32.xlu0 %v257_v29 }
 0x54d   :  { %313 = vrot.lane.b32.xlu0 %v1717_v15, %s1895_s23 }
 0x5a4   :  { %v256_v33 = vpop.xlane.xlu0 %255 }
 0x5a5   :  { %v260_v34 = vmul.f32 %v256_v33, %v2004_v19  ;;  %v1718_v33 = vld [vmem:[%s2309_s5 + $0x2] ss:$0 sm:$0xff] }
 0x5a7   :  { %v262_v38 = vadd.f32 1e-05, %v260_v34 }
 0x5a9   :  { %1731 = vrsqrt.f32 %v262_v38  ;;  %vm270_vm10 = vweird.f32 %v262_v38 }
 0x5ac   :  { %v259_v39 = vpop.xlane.xlu0 %258 }
 0x5ad   :  { %v261_v40 = vmul.f32 %v259_v39, %v2004_v19 }
 0x5af   :  { %v1732_v41 = vpop.eup %1731  ;;  %v263_v42 = vadd.f32 1e-05, %v261_v40 }
 0x5b0   :  { %v265_v43 = vmul.f32 %v1732_v41, %v262_v38  ;;  %vm271_vm9 = vweird.f32 %v1732_v41 }
 0x5b1   :  { %1733 = vrsqrt.f32 %v263_v42  ;;  %vm272_vm11 = vmor %vm270_vm10, %vm271_vm9  ;;  %vm280_vm13 = vweird.f32 %v263_v42 }
 0x5b2   :  { %v266_v44 = vmul.f32 %v1732_v41, %v265_v43  ;;  %v1654_v43 = vld [vmem:[%s2310_s3 + $0x28] sm:$0xf0] }
 0x5b4   :  { %v267_v45 = vmul.f32 0.5, %v266_v44 }
 0x5b6   :  { %v268_v46 = vsub.f32 1.5, %v267_v45  ;;  %v2062_v45 = vld [vmem:[%s2312_s4] sm:$0xff] }
 0x5b7   :  { %v1734_v47 = vpop.eup %1733  ;;  %602 = vmatpush.bf16.msra.mxu3 %v2062_v45  ;;  %716 = vmatpush.bf16.msra.mxu1 %v2062_v45 }
 0x5b8   :  { %v269_v48 = vmul.f32 %v1732_v41, %v268_v46  ;;  %v275_v49 = vmul.f32 %v1734_v47, %v263_v42  ;;  %vm281_vm12 = vweird.f32 %v1734_v47  ;;  %v1703_v42 = vld [vmem:[%s2310_s3 + $0x20] sm:$0xf]  ;;  %v1701_v46 = vld [vmem:[%s2310_s3 + $0x8] sm:$0xf]  ;;  %835 = vmatpush.bf16.msra.mxu2 %v2062_v45 }
 0x5b9   :  { %vm282_vm14 = vmor %vm280_vm13, %vm281_vm12  ;;  %v1657_v44 = vor.u32 %v1703_v42, %v1654_v43 }
 0x5ba   :  { %v276_v50 = vmul.f32 %v1734_v47, %v275_v49  ;;  %v273_v52 = vsel %vm272_vm11, %v1732_v41, %v269_v48  ;;  %603 = vmatmul.bf16.vlgmr.msra.gmra.mxu3 %v1891_v0  ;;  %v491_v49 = vpop.permute.xlu2 %490 }
 0x5bb   :  { %v284_v54 = vmul.f32 %v273_v52, %v250_v22  ;;  %1073 = vmatpush.bf16.msrb.mxu3 %v2062_v45 }
 0x5bc   :  { %v277_v51 = vmul.f32 0.5, %v276_v50 }
 0x5bd   :  { %v289_v58 = vmul.f32 %v1717_v15, %v284_v54 }
 0x5be   :  { %v278_v53 = vsub.f32 1.5, %v277_v51 }
 0x5bf   :  { %v294_v61 = vadd.f32 %v292_v59, %v289_v58  ;;  %v314_v4 = vpop.permute.xlu0 %313 }
 0x5c0   :  { %v279_v55 = vmul.f32 %v1734_v47, %v278_v53 }
 0x5c2   :  { %v283_v56 = vsel %vm282_vm14, %v1734_v47, %v279_v55  ;;  %v1646_v47 = vld [vmem:[%s2310_s3 + $0x10] sm:$0xf0]  ;;  %vm701_vm14 = vcmask 1041409  }
 0x5c3   :  { %v285_v57 = vmul.f32 %v283_v56, %v251_v27  ;;  %v1649_v48 = vor.u32 %v1701_v46, %v1646_v47 }
 0x5c5   :  { %v290_v60 = vmul.f32 %v1717_v15, %v285_v57 }
 0x5c7   :  { %v295_v62 = vadd.f32 %v292_v59, %v290_v60 }
 0x5c9   :  { %v300_v63 = vpack.c.bf16 %v295_v62, %v294_v61 }
 0x5cb   :  { %1624 = vmatmul.msk.bf16.vlgmr.msrb.gmra.mxu1 %vm117_vm6, %v300_v63 }
 0x5cc   :  { %1192 = vmatpush.bf16.msrb.mxu1 %v2062_v45 }
 0x63d   :  { %v604_v5 = vpop.f32.mrf.mxu3 }
 0x648   :  { %v328_v6 = vpop.f32.mrf.mxu1 }
 0x649   :  { %v329_v7 = vadd.f32 %v328_v6, %v314_v4  ;;  %v465_v6 = vld [vmem:[%s2309_s5 + $0x2] sm:$0x3] }
 0x64a   :  { %v469_v9 = vperm.slane %v465_v6, 1  ;;  %v468_v10 = vperm.slane %v465_v6, 0 }
 0x64b   :  { %v333_v8 = vmul.f32 %v329_v7, %v329_v7 }
 0x64d   :  { %v335_v11 = vmul.f32 %v333_v8, %v329_v7  ;;  %v610_v8 = vrot.slane %v604_v5, 2 }
 0x64f   :  { %v337_v13 = vmul.f32 0.044715, %v335_v11 }
 0x650   :  { %v330_v14 = vpop.f32.mrf.mxu1 }
 0x651   :  { %v339_v15 = vadd.f32 %v337_v13, %v329_v7  ;;  %v331_v16 = vadd.f32 %v330_v14, %v314_v4 }
 0x653   :  { %v341_v17 = vmul.f32 0.7978846, %v339_v15  ;;  %v334_v18 = vmul.f32 %v331_v16, %v331_v16 }
 0x655   :  { %v336_v20 = vmul.f32 %v334_v18, %v331_v16  ;;  %1735 = vtanh.f32 %v341_v17  ;;  %v609_v17 = vrot.slane %v604_v5, 1  ;;  %v606_v18 = vpop.f32.mrf.mxu3 }
 0x657   :  { %v338_v21 = vmul.f32 0.044715, %v336_v20 }
 0x659   :  { %v340_v22 = vadd.f32 %v338_v21, %v331_v16 }
 0x65b   :  { %v342_v23 = vmul.f32 0.7978846, %v340_v22  ;;  %v1736_v24 = vpop.eup %1735 }
 0x65c   :  { %v345_v25 = vadd.f32 1.0, %v1736_v24 }
 0x65d   :  { %1737 = vtanh.f32 %v342_v23 }
 0x65e   :  { %v347_v27 = vmul.f32 0.5, %v345_v25 }
 0x660   :  { %v349_v30 = vmul.f32 %v347_v27, %v329_v7 }
 0x663   :  { %v1738_v26 = vpop.eup %1737 }
 0x664   :  { %v346_v28 = vadd.f32 1.0, %v1738_v26 }
 0x666   :  { %v348_v29 = vmul.f32 0.5, %v346_v28 }
 0x668   :  { %v350_v31 = vmul.f32 %v348_v29, %v331_v16 }
 0x66a   :  { %v360_v32 = vpack.c.bf16 %v350_v31, %v349_v30 }
 0x66c   :  { %1641 = vmatmul.msk.bf16.vlgmr.msrb.gmra.mxu2 %vm78_vm5, %v360_v32 }
 0x66d   :  { %1311 = vmatpush.bf16.msrb.mxu2 %v2062_v45 }
 0x6ef   :  { %v400_v34 = vpop.f32.mrf.mxu2 }
 0x6f0   :  { %v401_v35 = vadd.f32 %v1718_v33, %v400_v34 }
 0x6f2   :  { %v405_v36 = vadd.f32 %v401_v35, %v294_v61  ;;  %v1644_v61 = vld [vmem:[%s2310_s3 + $0x4] sm:$0xf] }
 0x6f4   :  { %v407_v37 = vsel %vm117_vm6, %v405_v36, 0.0 }
 0x6f5   :  { %408 = vadd.xlane.f32.xlu1 %v407_v37 }
 0x6f7   :  { %v402_v38 = vpop.f32.mrf.mxu2 }
 0x6f8   :  { %v403_v39 = vadd.f32 %v1718_v33, %v402_v38 }
 0x6fa   :  { %v406_v40 = vadd.f32 %v403_v39, %v295_v62  ;;  %v1702_v62 = vld [vmem:[%s2310_s3 + $0xc] sm:$0xf0]  ;;  %s1897_s3 = smov 16  }
 0x6fb   :  { %v1645_v63 = vor.u32 %v1702_v62, %v1644_v61 }
 0x6fc   :  { %v410_v41 = vsel %vm117_vm6, %v406_v40, 0.0 }
 0x6fd   :  { %411 = vadd.xlane.f32.xlu2 %v410_v41 }
 0x70e   :  { %492 = vrot.lane.b32.xlu1 %v1657_v44, %s1895_s23 }
 0x715   :  { %451 = vrot.lane.b32.xlu2 %v1718_v33, %s1893_s18 }
 0x716   :  { %488 = vrot.lane.b32.xlu1 %v1649_v48, %s1895_s23 }
 0x71e   :  { %501 = vrot.lane.b32.xlu1 %v469_v9, %s1894_s1 }
 0x768   :  { %v409_v50 = vpop.xlane.xlu1 %408 }
 0x769   :  { %v413_v51 = vmul.f32 %v409_v50, %v2004_v19 }
 0x76b   :  { %v415_v52 = vsub.f32 %v405_v36, %v413_v51 }
 0x76d   :  { %v417_v53 = vmul.f32 %v415_v52, %v415_v52 }
 0x76f   :  { %v419_v54 = vsel %vm117_vm6, %v417_v53, 0.0 }
 0x770   :  { %v412_v55 = vpop.xlane.xlu2 %411  ;;  %420 = vadd.xlane.f32.xlu0 %v419_v54 }
 0x771   :  { %v414_v56 = vmul.f32 %v412_v55, %v2004_v19 }
 0x773   :  { %v416_v57 = vsub.f32 %v406_v40, %v414_v56 }
 0x775   :  { %v418_v58 = vmul.f32 %v416_v57, %v416_v57 }
 0x777   :  { %v422_v59 = vsel %vm117_vm6, %v418_v58, 0.0 }
 0x778   :  { %423 = vadd.xlane.f32.xlu2 %v422_v59  ;;  %v452_v1 = vpop.permute.xlu2 %451 }
 0x780   :  { %v493_v60 = vpop.permute.xlu1 %492 }
 0x781   :  { %v496_v0 = vsel %vm78_vm5, %v491_v49, %v493_v60 }
 0x782   :  { %514 = vmatpush.bf16.msrb.mxu0 %v496_v0 }
 0x784   :  { %456 = vrot.lane.b32.xlu0 %v1718_v33, %s1895_s23 }
 0x788   :  { %v489_v16 = vpop.permute.xlu1 %488 }
 0x78c   :  { %613 = vrot.lane.b32.xlu0 %v610_v8, %s1895_s23 }
 0x790   :  { %486 = vrot.lane.b32.xlu2 %v1645_v63, %s1895_s23  ;;  %v502_v41 = vpop.permute.xlu1 %501 }
 0x798   :  { %499 = vrot.lane.b32.xlu2 %v468_v10, %s1894_s1 }
 0x7a0   :  { %611 = vrot.lane.b32.xlu2 %v609_v17, %s1895_s23 }
 0x7e3   :  { %v421_v2 = vpop.xlane.xlu0 %420 }
 0x7e4   :  { %v425_v3 = vmul.f32 %v421_v2, %v2004_v19 }
 0x7e6   :  { %v427_v4 = vadd.f32 1e-05, %v425_v3 }
 0x7e8   :  { %1739 = vrsqrt.f32 %v427_v4  ;;  %vm435_vm0 = vweird.f32 %v427_v4 }
 0x7eb   :  { %v424_v7 = vpop.xlane.xlu2 %423 }
 0x7ec   :  { %v426_v11 = vmul.f32 %v424_v7, %v2004_v19 }
 0x7ee   :  { %v1740_v12 = vpop.eup %1739  ;;  %v428_v13 = vadd.f32 1e-05, %v426_v11 }
 0x7ef   :  { %v430_v14 = vmul.f32 %v1740_v12, %v427_v4  ;;  %vm436_vm15 = vweird.f32 %v1740_v12 }
 0x7f0   :  { %1741 = vrsqrt.f32 %v428_v13  ;;  %vm437_vm1 = vmor %vm435_vm0, %vm436_vm15  ;;  %vm445_vm3 = vweird.f32 %v428_v13 }
 0x7f1   :  { %v431_v15 = vmul.f32 %v1740_v12, %v430_v14 }
 0x7f3   :  { %v432_v20 = vmul.f32 0.5, %v431_v15  ;;  %v487_v21 = vpop.permute.xlu2 %486 }
 0x7f4   :  { %v495_v22 = vsel %vm78_vm5, %v487_v21, %v489_v16 }
 0x7f5   :  { %v433_v23 = vsub.f32 1.5, %v432_v20  ;;  %515 = vmatpush.bf16.msrb.mxu0 %v495_v22 }
 0x7f6   :  { %v1742_v19 = vpop.eup %1741  ;;  %v457_v35 = vpop.permute.xlu0 %456 }
 0x7f7   :  { %v434_v24 = vmul.f32 %v1740_v12, %v433_v23  ;;  %v440_v25 = vmul.f32 %v1742_v19, %v428_v13  ;;  %vm446_vm2 = vweird.f32 %v1742_v19 }
 0x7f8   :  { %vm447_vm4 = vmor %vm445_vm3, %vm446_vm2 }
 0x7f9   :  { %954 = vmatpush.bf16.msra.mxu0 %v2062_v45  ;;  %v441_v26 = vmul.f32 %v1742_v19, %v440_v25  ;;  %v438_v28 = vsel %vm437_vm1, %v1740_v12, %v434_v24 }
 0x7fa   :  { %v449_v30 = vmul.f32 %v438_v28, %v415_v52 }
 0x7fb   :  { %v442_v27 = vmul.f32 0.5, %v441_v26  ;;  %v500_v40 = vpop.permute.xlu2 %499 }
 0x7fc   :  { %v454_v34 = vmul.f32 %v452_v1, %v449_v30  ;;  %v503_v42 = vsel %vm117_vm6, %v500_v40, %v502_v41 }
 0x7fd   :  { %v443_v29 = vsub.f32 1.5, %v442_v27 }
 0x7fe   :  { %v459_v37 = vadd.f32 %v457_v35, %v454_v34  ;;  %v614_v49 = vpop.permute.xlu0 %613 }
 0x7ff   :  { %v444_v31 = vmul.f32 %v1742_v19, %v443_v29 }
 0x801   :  { %v448_v32 = vsel %vm447_vm4, %v1742_v19, %v444_v31 }
 0x802   :  { %v450_v33 = vmul.f32 %v448_v32, %v416_v57 }
 0x803   :  { %v612_v46 = vpop.permute.xlu2 %611 }
 0x804   :  { %v455_v36 = vmul.f32 %v452_v1, %v450_v33 }
 0x806   :  { %v460_v38 = vadd.f32 %v457_v35, %v455_v36 }
 0x808   :  { %v466_v39 = vpack.c.bf16 %v460_v38, %v459_v37 }
 0x80a   :  { %1658 = vmatmul.msk.bf16.vlgmr.msrb.gmra.mxu0 %vm117_vm6, %v466_v39 }
 0x80b   :  { %1428 = vmatpush.bf16.msrb.mxu0 %v2062_v45 }
 0x887   :  { %v517_v43 = vpop.f32.mrf.mxu0 }
 0x888   :  { %v2105_v44 = vadd.f32 %v517_v43, %v503_v42 }
 0x88a   :  { %v617_v47 = vadd.f32 %v612_v46, %v2105_v44 }
 0x88c   :  { %1743 = vtanh.f32 %v617_v47  ;;  %v1665_v56 = vmul.f32 -1.442695, %v617_v47 }
 0x88f   :  { %v519_v48 = vpop.f32.mrf.mxu0 }
 0x890   :  { %v2108_v50 = vadd.f32 %v519_v48, %v503_v42 }
 0x892   :  { %v1744_v51 = vpop.eup %1743  ;;  %v618_v52 = vadd.f32 %v614_v49, %v2108_v50 }
 0x893   :  { %663 = vrot.lane.b32.xlu1 %v1744_v51, %s1893_s18 }
 0x894   :  { %1745 = vtanh.f32 %v618_v52  ;;  %v1666_v53 = vmul.f32 -1.442695, %v618_v52 }
 0x896   :  { %1747 = vpow2.f32 %v1666_v53 }
 0x89a   :  { %v1746_v45 = vpop.eup %1745 }
 0x89b   :  { %665 = vrot.lane.b32.xlu2 %v1746_v45, %s1893_s18 }
 0x89c   :  { %v1748_v54 = vpop.eup %1747 }
 0x89d   :  { %v626_v55 = vadd.f32 1.0, %v1748_v54 }
 0x89f   :  { %1749 = vrcp.f32 %v626_v55  ;;  %v653_v1 = vand.u32 2147483648, %v626_v55  ;;  %vm647_vm6 = vweird.f32 %v626_v55  ;;  %v651_v2 = vand.u32 2147483647, %v626_v55 }
 0x8a0   :  { %1751 = vpow2.f32 %v1665_v56 }
 0x8a1   :  { %v654_v5 = vor.u32 1.1754944e-38, %v653_v1  ;;  %vm652_vm9 = vcmp.eq.f32.partialorder %v651_v2, 8.507059e+37 }
 0x8a5   :  { %v1750_v57 = vpop.eup %1749 }
 0x8a6   :  { %v1752_v58 = vpop.eup %1751  ;;  %v643_v59 = vmul.f32 %v1750_v57, %v626_v55  ;;  %vm648_vm5 = vweird.f32 %v1750_v57 }
 0x8a7   :  { %v625_v60 = vadd.f32 1.0, %v1752_v58  ;;  %vm649_vm8 = vmor %vm647_vm6, %vm648_vm5 }
 0x8a8   :  { %v644_v0 = vsub.f32 1.0, %v643_v59 }
 0x8a9   :  { %1753 = vrcp.f32 %v625_v60  ;;  %v638_v12 = vand.u32 2147483648, %v625_v60  ;;  %vm632_vm11 = vweird.f32 %v625_v60  ;;  %v636_v13 = vand.u32 2147483647, %v625_v60 }
 0x8aa   :  { %v645_v61 = vmul.f32 %v1750_v57, %v644_v0 }
 0x8ab   :  { %v639_v15 = vor.u32 1.1754944e-38, %v638_v12  ;;  %vm637_vm13 = vcmp.eq.f32.partialorder %v636_v13, 8.507059e+37 }
 0x8ac   :  { %v646_v62 = vadd.f32 %v1750_v57, %v645_v61 }
 0x8ae   :  { %v650_v3 = vsel %vm649_vm8, %v1750_v57, %v646_v62 }
 0x8af   :  { %v1754_v63 = vpop.eup %1753  ;;  %v655_v7 = vsel %vm652_vm9, %v654_v5, %v650_v3 }
 0x8b0   :  { %v628_v4 = vmul.f32 %v1754_v63, %v625_v60  ;;  %vm633_vm10 = vweird.f32 %v1754_v63  ;;  %v660_v20 = vmul.f32 0.0, %v655_v7 }
 0x8b1   :  { %vm634_vm12 = vmor %vm632_vm11, %vm633_vm10 }
 0x8b2   :  { %v629_v9 = vsub.f32 1.0, %v628_v4 }
 0x8b4   :  { %v630_v10 = vmul.f32 %v1754_v63, %v629_v9 }
 0x8b6   :  { %v631_v11 = vadd.f32 %v1754_v63, %v630_v10 }
 0x8b8   :  { %v635_v14 = vsel %vm634_vm12, %v1754_v63, %v631_v11 }
 0x8b9   :  { %v640_v17 = vsel %vm637_vm13, %v639_v15, %v635_v14 }
 0x8ba   :  { %v659_v19 = vmul.f32 0.0, %v640_v17 }
 0x8f5   :  { %v666_v6 = vpop.permute.xlu2 %665 }
 0x8f6   :  { %v670_v8 = vmul.f32 %v666_v6, %v655_v7 }
 0x8f8   :  { %675 = vrot.lane.b32.xlu1 %v670_v8, %s1897_s3 }
 0x905   :  { %v664_v16 = vpop.permute.xlu1 %663 }
 0x906   :  { %v669_v18 = vmul.f32 %v664_v16, %v640_v17 }
 0x908   :  { %673 = vrot.lane.b32.xlu0 %v669_v18, %s1897_s3 }
 0x96a   :  { %v676_v21 = vpop.permute.xlu1 %675 }
 0x96b   :  { %v2115_v22 = vadd.f32 %v676_v21, %v660_v20 }
 0x96d   :  { %1755 = vtanh.f32 %v2115_v22  ;;  %v776_v18 = vrot.slane %v2115_v22, 1 }
 0x973   :  { %v1756_v23 = vpop.eup %1755 }
 0x974   :  { %687 = vrot.lane.b32.xlu0 %v1756_v23, %s1894_s1 }
 0x97a   :  { %v674_v24 = vpop.permute.xlu0 %673 }
 0x97b   :  { %v2119_v25 = vadd.f32 %v674_v24, %v659_v19 }
 0x97d   :  { %1757 = vtanh.f32 %v2119_v25  ;;  %v775_v20 = vrot.slane %v2119_v25, 1 }
 0x983   :  { %v1758_v26 = vpop.eup %1757 }
 0x984   :  { %685 = vrot.lane.b32.xlu2 %v1758_v26, %s1894_s1 }
 0x9de   :  { %v686_v27 = vpop.permute.xlu2 %685 }
 0x9df   :  { %v691_v28 = vmul.f32 %v686_v27, %v640_v17 }
 0x9e1   :  { %v693_v29 = vpack.c.bf16 %v691_v28, %v691_v28 }
 0x9e3   :  { %v697_v32 = vunpack.c.l.b16 %v693_v29 }
 0x9e5   :  { %v699_v35 = vrot.slane %v697_v32, 7 }
 0x9e6   :  { %v688_v30 = vpop.permute.xlu0 %687 }
 0x9e7   :  { %v692_v31 = vmul.f32 %v688_v30, %v655_v7 }
 0x9e9   :  { %v694_v33 = vpack.c.bf16 %v692_v31, %v692_v31 }
 0x9eb   :  { %v698_v34 = vunpack.c.l.b16 %v694_v33 }
 0x9ed   :  { %v700_v36 = vrot.slane %v698_v34, 6 }
 0x9ef   :  { %v702_v37 = vsel %vm701_vm14, %v700_v36, %v699_v35 }
 0x9f0   :  { %v703_v38 = vpack.c.b16 %v702_v37, %v702_v37 }
 0x9f2   :  { %704 = vrot.lane.b32.xlu1 %v703_v38, %s1897_s3 }
 0xa64   :  { %v705_v39 = vpop.permute.xlu1 %704 }
 0xa65   :  { %1667 = vmatmul.msk.bf16.vlgmr.msra.gmra.mxu1 %vm161_vm7, %v705_v39 }
 0xae2   :  { %v718_v40 = vpop.f32.mrf.mxu1 }
 0xae3   :  { %v723_v41 = vrot.slane %v718_v40, 2  ;;  %v724_v42 = vrot.slane %v718_v40, 3 }
 0xae5   :  { %727 = vrot.lane.b32.xlu0 %v724_v42, %s1895_s23  ;;  %725 = vrot.lane.b32.xlu2 %v723_v41, %s1895_s23 }
 0xaea   :  { %v720_v43 = vpop.f32.mrf.mxu1 }
 0xb3f   :  { %v726_v46 = vpop.permute.xlu2 %725 }
 0xb40   :  { %v731_v47 = vadd.f32 %v726_v46, %v2105_v44 }
 0xb42   :  { %1759 = vtanh.f32 %v731_v47  ;;  %v1668_v45 = vmul.f32 -1.442695, %v731_v47 }
 0xb48   :  { %v1760_v48 = vpop.eup %1759 }
 0xb49   :  { %783 = vrot.lane.b32.xlu1 %v1760_v48, %s1893_s18 }
 0xb57   :  { %v728_v49 = vpop.permute.xlu0 %727 }
 0xb58   :  { %v732_v51 = vadd.f32 %v728_v49, %v2108_v50 }
 0xb5a   :  { %1761 = vtanh.f32 %v732_v51  ;;  %v1669_v53 = vmul.f32 -1.442695, %v732_v51 }
 0xb5b   :  { %1763 = vpow2.f32 %v1668_v45 }
 0xb5c   :  { %1765 = vpow2.f32 %v1669_v53 }
 0xb60   :  { %v1762_v52 = vpop.eup %1761 }
 0xb61   :  { %785 = vrot.lane.b32.xlu2 %v1762_v52, %s1893_s18  ;;  %v1764_v54 = vpop.eup %1763 }
 0xb62   :  { %v1766_v55 = vpop.eup %1765  ;;  %v739_v56 = vadd.f32 1.0, %v1764_v54 }
 0xb63   :  { %v740_v57 = vadd.f32 1.0, %v1766_v55 }
 0xb64   :  { %1767 = vrcp.f32 %v739_v56  ;;  %vm746_vm1 = vweird.f32 %v739_v56  ;;  %v752_v4 = vand.u32 2147483648, %v739_v56  ;;  %v750_v6 = vand.u32 2147483647, %v739_v56 }
 0xb65   :  { %1769 = vrcp.f32 %v740_v57  ;;  %v767_v5 = vand.u32 2147483648, %v740_v57  ;;  %vm761_vm3 = vweird.f32 %v740_v57  ;;  %v765_v7 = vand.u32 2147483647, %v740_v57 }
 0xb66   :  { %v753_v10 = vor.u32 1.1754944e-38, %v752_v4  ;;  %vm751_vm5 = vcmp.eq.f32.partialorder %v750_v6, 8.507059e+37 }
 0xb67   :  { %v768_v11 = vor.u32 1.1754944e-38, %v767_v5  ;;  %vm766_vm6 = vcmp.eq.f32.partialorder %v765_v7, 8.507059e+37 }
 0xb6a   :  { %v1768_v58 = vpop.eup %1767 }
 0xb6b   :  { %v1770_v59 = vpop.eup %1769  ;;  %v742_v60 = vmul.f32 %v1768_v58, %v739_v56  ;;  %vm747_vm15 = vweird.f32 %v1768_v58 }
 0xb6c   :  { %v757_v0 = vmul.f32 %v1770_v59, %v740_v57  ;;  %vm762_vm0 = vweird.f32 %v1770_v59  ;;  %vm748_vm2 = vmor %vm746_vm1, %vm747_vm15 }
 0xb6d   :  { %v743_v61 = vsub.f32 1.0, %v742_v60  ;;  %vm763_vm4 = vmor %vm761_vm3, %vm762_vm0 }
 0xb6e   :  { %v758_v62 = vsub.f32 1.0, %v757_v0 }
 0xb6f   :  { %v744_v63 = vmul.f32 %v1768_v58, %v743_v61 }
 0xb70   :  { %v759_v1 = vmul.f32 %v1770_v59, %v758_v62 }
 0xb71   :  { %v745_v2 = vadd.f32 %v1768_v58, %v744_v63 }
 0xb72   :  { %v760_v3 = vadd.f32 %v1770_v59, %v759_v1 }
 0xb73   :  { %v749_v8 = vsel %vm748_vm2, %v1768_v58, %v745_v2 }
 0xb74   :  { %v764_v9 = vsel %vm763_vm4, %v1770_v59, %v760_v3  ;;  %v754_v13 = vsel %vm751_vm5, %v753_v10, %v749_v8 }
 0xb75   :  { %v769_v14 = vsel %vm766_vm6, %v768_v11, %v764_v9  ;;  %v779_v21 = vmul.f32 %v775_v20, %v754_v13 }
 0xb76   :  { %v780_v23 = vmul.f32 %v776_v18, %v769_v14 }
 0xbbb   :  { %v784_v12 = vpop.permute.xlu1 %783  ;;  %v786_v15 = vpop.permute.xlu2 %785 }
 0xbbc   :  { %v789_v16 = vmul.f32 %v784_v12, %v754_v13  ;;  %v790_v17 = vmul.f32 %v786_v15, %v769_v14 }
 0xbbe   :  { %793 = vrot.lane.b32.xlu0 %v789_v16, %s1897_s3  ;;  %795 = vrot.lane.b32.xlu1 %v790_v17, %s1897_s3 }
 0xc30   :  { %v794_v19 = vpop.permute.xlu0 %793  ;;  %v796_v24 = vpop.permute.xlu1 %795 }
 0xc31   :  { %v2136_v26 = vadd.f32 %v794_v19, %v779_v21  ;;  %v2138_v27 = vadd.f32 %v796_v24, %v780_v23 }
 0xc33   :  { %1771 = vtanh.f32 %v2136_v26  ;;  %v894_v20 = vrot.slane %v2136_v26, 1  ;;  %v895_v21 = vrot.slane %v2138_v27, 1 }
 0xc34   :  { %1773 = vtanh.f32 %v2138_v27 }
 0xc39   :  { %v1772_v28 = vpop.eup %1771 }
 0xc3a   :  { %v1774_v29 = vpop.eup %1773  ;;  %805 = vrot.lane.b32.xlu2 %v1772_v28, %s1894_s1 }
 0xc3b   :  { %807 = vrot.lane.b32.xlu0 %v1774_v29, %s1894_s1 }
 0xc94   :  { %v806_v22 = vpop.permute.xlu2 %805 }
 0xc95   :  { %v811_v25 = vmul.f32 %v806_v22, %v754_v13 }
 0xc97   :  { %v813_v30 = vpack.c.bf16 %v811_v25, %v811_v25 }
 0xc99   :  { %v817_v33 = vunpack.c.l.b16 %v813_v30 }
 0xc9b   :  { %v819_v36 = vrot.slane %v817_v33, 6 }
 0xcad   :  { %v808_v31 = vpop.permute.xlu0 %807 }
 0xcae   :  { %v812_v32 = vmul.f32 %v808_v31, %v769_v14 }
 0xcb0   :  { %v814_v34 = vpack.c.bf16 %v812_v32, %v812_v32 }
 0xcb2   :  { %v818_v35 = vunpack.c.l.b16 %v814_v34 }
 0xcb4   :  { %v820_v37 = vrot.slane %v818_v35, 5 }
 0xcb6   :  { %v821_v38 = vsel %vm701_vm14, %v820_v37, %v819_v36 }
 0xcb7   :  { %v822_v39 = vpack.c.b16 %v821_v38, %v821_v38 }
 0xcb9   :  { %823 = vrot.lane.b32.xlu1 %v822_v39, %s1897_s3 }
 0xd2b   :  { %v824_v40 = vpop.permute.xlu1 %823 }
 0xd2c   :  { %1670 = vmatmul.msk.bf16.vlgmr.msra.gmra.mxu2 %vm161_vm7, %v824_v40 }
 0xdaf   :  { %v837_v41 = vpop.f32.mrf.mxu2 }
 0xdb0   :  { %v842_v42 = vrot.slane %v837_v41, 3  ;;  %v843_v43 = vrot.slane %v837_v41, 4 }
 0xdb2   :  { %846 = vrot.lane.b32.xlu0 %v843_v43, %s1895_s23  ;;  %844 = vrot.lane.b32.xlu2 %v842_v42, %s1895_s23 }
 0xdb7   :  { %v839_v46 = vpop.f32.mrf.mxu2 }
 0xe0c   :  { %v845_v47 = vpop.permute.xlu2 %844 }
 0xe0d   :  { %v850_v48 = vadd.f32 %v845_v47, %v2105_v44 }
 0xe0f   :  { %1775 = vtanh.f32 %v850_v48  ;;  %v1671_v53 = vmul.f32 -1.442695, %v850_v48 }
 0xe15   :  { %v1776_v49 = vpop.eup %1775 }
 0xe16   :  { %902 = vrot.lane.b32.xlu1 %v1776_v49, %s1893_s18 }
 0xe24   :  { %v847_v51 = vpop.permute.xlu0 %846 }
 0xe25   :  { %v851_v52 = vadd.f32 %v847_v51, %v2108_v50 }
 0xe27   :  { %1777 = vtanh.f32 %v851_v52  ;;  %v1672_v54 = vmul.f32 -1.442695, %v851_v52 }
 0xe28   :  { %1779 = vpow2.f32 %v1671_v53 }
 0xe29   :  { %1781 = vpow2.f32 %v1672_v54 }
 0xe2d   :  { %v1778_v45 = vpop.eup %1777 }
 0xe2e   :  { %904 = vrot.lane.b32.xlu2 %v1778_v45, %s1893_s18  ;;  %v1780_v55 = vpop.eup %1779 }
 0xe2f   :  { %v1782_v56 = vpop.eup %1781  ;;  %v858_v57 = vadd.f32 1.0, %v1780_v55 }
 0xe30   :  { %v859_v58 = vadd.f32 1.0, %v1782_v56 }
 0xe31   :  { %1783 = vrcp.f32 %v858_v57  ;;  %vm865_vm10 = vweird.f32 %v858_v57  ;;  %v871_v5 = vand.u32 2147483648, %v858_v57  ;;  %v869_v7 = vand.u32 2147483647, %v858_v57 }
 0xe32   :  { %1785 = vrcp.f32 %v859_v58  ;;  %v886_v6 = vand.u32 2147483648, %v859_v58  ;;  %vm880_vm12 = vweird.f32 %v859_v58  ;;  %v884_v8 = vand.u32 2147483647, %v859_v58 }
 0xe33   :  { %v872_v11 = vor.u32 1.1754944e-38, %v871_v5  ;;  %vm870_vm15 = vcmp.eq.f32.partialorder %v869_v7, 8.507059e+37 }
 0xe34   :  { %v887_v12 = vor.u32 1.1754944e-38, %v886_v6  ;;  %vm885_vm0 = vcmp.eq.f32.partialorder %v884_v8, 8.507059e+37 }
 0xe37   :  { %v1784_v59 = vpop.eup %1783 }
 0xe38   :  { %v1786_v60 = vpop.eup %1785  ;;  %v861_v0 = vmul.f32 %v1784_v59, %v858_v57  ;;  %vm866_vm8 = vweird.f32 %v1784_v59 }
 0xe39   :  { %v876_v61 = vmul.f32 %v1786_v60, %v859_v58  ;;  %vm881_vm9 = vweird.f32 %v1786_v60  ;;  %vm867_vm11 = vmor %vm865_vm10, %vm866_vm8 }
 0xe3a   :  { %v862_v62 = vsub.f32 1.0, %v861_v0  ;;  %vm882_vm13 = vmor %vm880_vm12, %vm881_vm9 }
 0xe3b   :  { %v877_v63 = vsub.f32 1.0, %v876_v61 }
 0xe3c   :  { %v863_v1 = vmul.f32 %v1784_v59, %v862_v62 }
 0xe3d   :  { %v878_v2 = vmul.f32 %v1786_v60, %v877_v63 }
 0xe3e   :  { %v864_v3 = vadd.f32 %v1784_v59, %v863_v1 }
 0xe3f   :  { %v879_v4 = vadd.f32 %v1786_v60, %v878_v2 }
 0xe40   :  { %v868_v9 = vsel %vm867_vm11, %v1784_v59, %v864_v3 }
 0xe41   :  { %v883_v10 = vsel %vm882_vm13, %v1786_v60, %v879_v4  ;;  %v873_v14 = vsel %vm870_vm15, %v872_v11, %v868_v9 }
 0xe42   :  { %v888_v15 = vsel %vm885_vm0, %v887_v12, %v883_v10  ;;  %v898_v23 = vmul.f32 %v894_v20, %v873_v14 }
 0xe43   :  { %v899_v19 = vmul.f32 %v895_v21, %v888_v15 }
 0xe88   :  { %v903_v13 = vpop.permute.xlu1 %902  ;;  %v905_v16 = vpop.permute.xlu2 %904 }
 0xe89   :  { %v908_v17 = vmul.f32 %v903_v13, %v873_v14  ;;  %v909_v18 = vmul.f32 %v905_v16, %v888_v15 }
 0xe8b   :  { %912 = vrot.lane.b32.xlu0 %v908_v17, %s1897_s3  ;;  %914 = vrot.lane.b32.xlu1 %v909_v18, %s1897_s3 }
 0xefd   :  { %v913_v24 = vpop.permute.xlu0 %912  ;;  %v915_v28 = vpop.permute.xlu1 %914 }
 0xefe   :  { %v2157_v29 = vadd.f32 %v913_v24, %v898_v23  ;;  %v2159_v22 = vadd.f32 %v915_v28, %v899_v19 }
 0xf00   :  { %1787 = vtanh.f32 %v2157_v29  ;;  %v1013_v21 = vrot.slane %v2157_v29, 1  ;;  %v1014_v23 = vrot.slane %v2159_v22, 1 }
 0xf01   :  { %1789 = vtanh.f32 %v2159_v22 }
 0xf06   :  { %v1788_v25 = vpop.eup %1787 }
 0xf07   :  { %v1790_v30 = vpop.eup %1789  ;;  %924 = vrot.lane.b32.xlu2 %v1788_v25, %s1894_s1 }
 0xf08   :  { %926 = vrot.lane.b32.xlu0 %v1790_v30, %s1894_s1 }
 0xf61   :  { %v925_v26 = vpop.permute.xlu2 %924 }
 0xf62   :  { %v930_v27 = vmul.f32 %v925_v26, %v873_v14 }
 0xf64   :  { %v932_v31 = vpack.c.bf16 %v930_v27, %v930_v27 }
 0xf66   :  { %v936_v34 = vunpack.c.l.b16 %v932_v31 }
 0xf68   :  { %v938_v37 = vrot.slane %v936_v34, 5 }
 0xf7a   :  { %v927_v32 = vpop.permute.xlu0 %926 }
 0xf7b   :  { %v931_v33 = vmul.f32 %v927_v32, %v888_v15 }
 0xf7d   :  { %v933_v35 = vpack.c.bf16 %v931_v33, %v931_v33 }
 0xf7f   :  { %v937_v36 = vunpack.c.l.b16 %v933_v35 }
 0xf81   :  { %v939_v38 = vrot.slane %v937_v36, 4 }
 0xf83   :  { %v940_v39 = vsel %vm701_vm14, %v939_v38, %v938_v37 }
 0xf84   :  { %v941_v40 = vpack.c.b16 %v940_v39, %v940_v39 }
 0xf86   :  { %942 = vrot.lane.b32.xlu1 %v941_v40, %s1897_s3 }
 0xff8   :  { %v943_v41 = vpop.permute.xlu1 %942 }
 0xff9   :  { %1673 = vmatmul.msk.bf16.vlgmr.msra.gmra.mxu0 %vm161_vm7, %v943_v41 }
0x1076   :  { %v956_v42 = vpop.f32.mrf.mxu0 }
0x1077   :  { %v961_v43 = vrot.slane %v956_v42, 4  ;;  %v962_v46 = vrot.slane %v956_v42, 5 }
0x1079   :  { %965 = vrot.lane.b32.xlu0 %v962_v46, %s1895_s23  ;;  %963 = vrot.lane.b32.xlu2 %v961_v43, %s1895_s23 }
0x107e   :  { %v958_v47 = vpop.f32.mrf.mxu0 }
0x10d3   :  { %v964_v48 = vpop.permute.xlu2 %963 }
0x10d4   :  { %v969_v49 = vadd.f32 %v964_v48, %v2105_v44 }
0x10d6   :  { %1791 = vtanh.f32 %v969_v49  ;;  %v1674_v54 = vmul.f32 -1.442695, %v969_v49 }
0x10dc   :  { %v1792_v51 = vpop.eup %1791 }
0x10dd   :  { %1021 = vrot.lane.b32.xlu1 %v1792_v51, %s1893_s18 }
0x10eb   :  { %v966_v52 = vpop.permute.xlu0 %965 }
0x10ec   :  { %v970_v45 = vadd.f32 %v966_v52, %v2108_v50 }
0x10ee   :  { %1793 = vtanh.f32 %v970_v45  ;;  %v1675_v55 = vmul.f32 -1.442695, %v970_v45 }
0x10ef   :  { %1795 = vpow2.f32 %v1674_v54 }
0x10f0   :  { %1797 = vpow2.f32 %v1675_v55 }
0x10f4   :  { %v1794_v53 = vpop.eup %1793 }
0x10f5   :  { %1023 = vrot.lane.b32.xlu2 %v1794_v53, %s1893_s18  ;;  %v1796_v56 = vpop.eup %1795 }
0x10f6   :  { %v1798_v57 = vpop.eup %1797  ;;  %v977_v58 = vadd.f32 1.0, %v1796_v56 }
0x10f7   :  { %v978_v59 = vadd.f32 1.0, %v1798_v57 }
0x10f8   :  { %1799 = vrcp.f32 %v977_v58  ;;  %vm984_vm3 = vweird.f32 %v977_v58  ;;  %v990_v6 = vand.u32 2147483648, %v977_v58  ;;  %v988_v8 = vand.u32 2147483647, %v977_v58 }
0x10f9   :  { %1801 = vrcp.f32 %v978_v59  ;;  %v1005_v7 = vand.u32 2147483648, %v978_v59  ;;  %vm999_vm5 = vweird.f32 %v978_v59  ;;  %v1003_v9 = vand.u32 2147483647, %v978_v59 }
0x10fa   :  { %v991_v12 = vor.u32 1.1754944e-38, %v990_v6  ;;  %vm989_vm8 = vcmp.eq.f32.partialorder %v988_v8, 8.507059e+37 }
0x10fb   :  { %v1006_v13 = vor.u32 1.1754944e-38, %v1005_v7  ;;  %vm1004_vm9 = vcmp.eq.f32.partialorder %v1003_v9, 8.507059e+37 }
0x10fe   :  { %v1800_v60 = vpop.eup %1799 }
0x10ff   :  { %v1802_v0 = vpop.eup %1801  ;;  %v980_v61 = vmul.f32 %v1800_v60, %v977_v58  ;;  %vm985_vm1 = vweird.f32 %v1800_v60 }
0x1100   :  { %v995_v62 = vmul.f32 %v1802_v0, %v978_v59  ;;  %vm1000_vm2 = vweird.f32 %v1802_v0  ;;  %vm986_vm4 = vmor %vm984_vm3, %vm985_vm1 }
0x1101   :  { %v981_v63 = vsub.f32 1.0, %v980_v61  ;;  %vm1001_vm6 = vmor %vm999_vm5, %vm1000_vm2 }
0x1102   :  { %v996_v1 = vsub.f32 1.0, %v995_v62 }
0x1103   :  { %v982_v2 = vmul.f32 %v1800_v60, %v981_v63 }
0x1104   :  { %v997_v3 = vmul.f32 %v1802_v0, %v996_v1 }
0x1105   :  { %v983_v4 = vadd.f32 %v1800_v60, %v982_v2 }
0x1106   :  { %v998_v5 = vadd.f32 %v1802_v0, %v997_v3 }
0x1107   :  { %v987_v10 = vsel %vm986_vm4, %v1800_v60, %v983_v4 }
0x1108   :  { %v1002_v11 = vsel %vm1001_vm6, %v1802_v0, %v998_v5  ;;  %v992_v15 = vsel %vm989_vm8, %v991_v12, %v987_v10 }
0x1109   :  { %v1007_v16 = vsel %vm1004_vm9, %v1006_v13, %v1002_v11  ;;  %v1017_v19 = vmul.f32 %v1013_v21, %v992_v15 }
0x110a   :  { %v1018_v24 = vmul.f32 %v1014_v23, %v1007_v16 }
0x114f   :  { %v1022_v14 = vpop.permute.xlu1 %1021  ;;  %v1024_v17 = vpop.permute.xlu2 %1023 }
0x1150   :  { %v1027_v18 = vmul.f32 %v1022_v14, %v992_v15  ;;  %v1028_v20 = vmul.f32 %v1024_v17, %v1007_v16 }
0x1152   :  { %1031 = vrot.lane.b32.xlu0 %v1027_v18, %s1897_s3  ;;  %1033 = vrot.lane.b32.xlu1 %v1028_v20, %s1897_s3 }
0x11c4   :  { %v1032_v28 = vpop.permute.xlu0 %1031  ;;  %v1034_v25 = vpop.permute.xlu1 %1033 }
0x11c5   :  { %v2178_v30 = vadd.f32 %v1032_v28, %v1017_v19  ;;  %v2180_v26 = vadd.f32 %v1034_v25, %v1018_v24 }
0x11c7   :  { %1803 = vtanh.f32 %v2178_v30  ;;  %v1132_v23 = vrot.slane %v2178_v30, 1  ;;  %v1133_v19 = vrot.slane %v2180_v26, 1 }
0x11c8   :  { %1805 = vtanh.f32 %v2180_v26 }
0x11cd   :  { %v1804_v27 = vpop.eup %1803 }
0x11ce   :  { %v1806_v31 = vpop.eup %1805  ;;  %1043 = vrot.lane.b32.xlu2 %v1804_v27, %s1894_s1 }
0x11cf   :  { %1045 = vrot.lane.b32.xlu0 %v1806_v31, %s1894_s1 }
0x1228   :  { %v1044_v29 = vpop.permute.xlu2 %1043 }
0x1229   :  { %v1049_v22 = vmul.f32 %v1044_v29, %v992_v15 }
0x122b   :  { %v1051_v32 = vpack.c.bf16 %v1049_v22, %v1049_v22 }
0x122d   :  { %v1055_v35 = vunpack.c.l.b16 %v1051_v32 }
0x122f   :  { %v1057_v38 = vrot.slane %v1055_v35, 4 }
0x1241   :  { %v1046_v33 = vpop.permute.xlu0 %1045 }
0x1242   :  { %v1050_v34 = vmul.f32 %v1046_v33, %v1007_v16 }
0x1244   :  { %v1052_v36 = vpack.c.bf16 %v1050_v34, %v1050_v34 }
0x1246   :  { %v1056_v37 = vunpack.c.l.b16 %v1052_v36 }
0x1248   :  { %v1058_v39 = vrot.slane %v1056_v37, 3 }
0x124a   :  { %v1059_v40 = vsel %vm701_vm14, %v1058_v39, %v1057_v38 }
0x124b   :  { %v1060_v41 = vpack.c.b16 %v1059_v40, %v1059_v40 }
0x124d   :  { %1061 = vrot.lane.b32.xlu1 %v1060_v41, %s1897_s3 }
0x12bf   :  { %v1062_v42 = vpop.permute.xlu1 %1061 }
0x12c0   :  { %1676 = vmatmul.msk.bf16.vlgmr.msrb.gmra.mxu3 %vm161_vm7, %v1062_v42 }
0x1343   :  { %v1075_v43 = vpop.f32.mrf.mxu3 }
0x1344   :  { %v1080_v46 = vrot.slane %v1075_v43, 5  ;;  %v1081_v47 = vrot.slane %v1075_v43, 6 }
0x1346   :  { %1084 = vrot.lane.b32.xlu0 %v1081_v47, %s1895_s23  ;;  %1082 = vrot.lane.b32.xlu2 %v1080_v46, %s1895_s23 }
0x134b   :  { %v1077_v48 = vpop.f32.mrf.mxu3 }
0x13a0   :  { %v1083_v49 = vpop.permute.xlu2 %1082 }
0x13a1   :  { %v1088_v51 = vadd.f32 %v1083_v49, %v2105_v44 }
0x13a3   :  { %1807 = vtanh.f32 %v1088_v51  ;;  %v1677_v55 = vmul.f32 -1.442695, %v1088_v51 }
0x13a9   :  { %v1808_v52 = vpop.eup %1807 }
0x13aa   :  { %1140 = vrot.lane.b32.xlu1 %v1808_v52, %s1893_s18 }
0x13b8   :  { %v1085_v45 = vpop.permute.xlu0 %1084 }
0x13b9   :  { %v1089_v53 = vadd.f32 %v1085_v45, %v2108_v50 }
0x13bb   :  { %1809 = vtanh.f32 %v1089_v53  ;;  %v1678_v56 = vmul.f32 -1.442695, %v1089_v53 }
0x13bc   :  { %1811 = vpow2.f32 %v1677_v55 }
0x13bd   :  { %1813 = vpow2.f32 %v1678_v56 }
0x13c1   :  { %v1810_v54 = vpop.eup %1809 }
0x13c2   :  { %1142 = vrot.lane.b32.xlu2 %v1810_v54, %s1893_s18  ;;  %v1812_v57 = vpop.eup %1811 }
0x13c3   :  { %v1814_v58 = vpop.eup %1813  ;;  %v1096_v59 = vadd.f32 1.0, %v1812_v57 }
0x13c4   :  { %v1097_v60 = vadd.f32 1.0, %v1814_v58 }
0x13c5   :  { %1815 = vrcp.f32 %v1096_v59  ;;  %vm1103_vm12 = vweird.f32 %v1096_v59  ;;  %v1109_v7 = vand.u32 2147483648, %v1096_v59  ;;  %v1107_v9 = vand.u32 2147483647, %v1096_v59 }
0x13c6   :  { %1817 = vrcp.f32 %v1097_v60  ;;  %v1124_v8 = vand.u32 2147483648, %v1097_v60  ;;  %vm1118_vm15 = vweird.f32 %v1097_v60  ;;  %v1122_v10 = vand.u32 2147483647, %v1097_v60 }
0x13c7   :  { %v1110_v13 = vor.u32 1.1754944e-38, %v1109_v7  ;;  %vm1108_vm1 = vcmp.eq.f32.partialorder %v1107_v9, 8.507059e+37 }
0x13c8   :  { %v1125_v14 = vor.u32 1.1754944e-38, %v1124_v8  ;;  %vm1123_vm2 = vcmp.eq.f32.partialorder %v1122_v10, 8.507059e+37 }
0x13cb   :  { %v1816_v0 = vpop.eup %1815 }
0x13cc   :  { %v1818_v61 = vpop.eup %1817  ;;  %v1099_v62 = vmul.f32 %v1816_v0, %v1096_v59  ;;  %vm1104_vm10 = vweird.f32 %v1816_v0 }
0x13cd   :  { %v1114_v63 = vmul.f32 %v1818_v61, %v1097_v60  ;;  %vm1119_vm11 = vweird.f32 %v1818_v61  ;;  %vm1105_vm13 = vmor %vm1103_vm12, %vm1104_vm10 }
0x13ce   :  { %v1100_v1 = vsub.f32 1.0, %v1099_v62  ;;  %vm1120_vm0 = vmor %vm1118_vm15, %vm1119_vm11 }
0x13cf   :  { %v1115_v2 = vsub.f32 1.0, %v1114_v63 }
0x13d0   :  { %v1101_v3 = vmul.f32 %v1816_v0, %v1100_v1 }
0x13d1   :  { %v1116_v4 = vmul.f32 %v1818_v61, %v1115_v2 }
0x13d2   :  { %v1102_v5 = vadd.f32 %v1816_v0, %v1101_v3 }
0x13d3   :  { %v1117_v6 = vadd.f32 %v1818_v61, %v1116_v4 }
0x13d4   :  { %v1106_v11 = vsel %vm1105_vm13, %v1816_v0, %v1102_v5 }
0x13d5   :  { %v1121_v12 = vsel %vm1120_vm0, %v1818_v61, %v1117_v6  ;;  %v1111_v16 = vsel %vm1108_vm1, %v1110_v13, %v1106_v11 }
0x13d6   :  { %v1126_v17 = vsel %vm1123_vm2, %v1125_v14, %v1121_v12  ;;  %v1136_v24 = vmul.f32 %v1132_v23, %v1111_v16 }
0x13d7   :  { %v1137_v28 = vmul.f32 %v1133_v19, %v1126_v17 }
0x141c   :  { %v1141_v15 = vpop.permute.xlu1 %1140  ;;  %v1143_v18 = vpop.permute.xlu2 %1142 }
0x141d   :  { %v1146_v20 = vmul.f32 %v1141_v15, %v1111_v16  ;;  %v1147_v21 = vmul.f32 %v1143_v18, %v1126_v17 }
0x141f   :  { %1150 = vrot.lane.b32.xlu0 %v1146_v20, %s1897_s3  ;;  %1152 = vrot.lane.b32.xlu1 %v1147_v21, %s1897_s3 }
0x1491   :  { %v1151_v25 = vpop.permute.xlu0 %1150  ;;  %v1153_v27 = vpop.permute.xlu1 %1152 }
0x1492   :  { %v2199_v31 = vadd.f32 %v1151_v25, %v1136_v24  ;;  %v2201_v29 = vadd.f32 %v1153_v27, %v1137_v28 }
0x1494   :  { %1819 = vtanh.f32 %v2199_v31  ;;  %v1251_v19 = vrot.slane %v2199_v31, 1  ;;  %v1252_v24 = vrot.slane %v2201_v29, 1 }
0x1495   :  { %1821 = vtanh.f32 %v2201_v29 }
0x149a   :  { %v1820_v22 = vpop.eup %1819 }
0x149b   :  { %v1822_v32 = vpop.eup %1821  ;;  %1162 = vrot.lane.b32.xlu2 %v1820_v22, %s1894_s1 }
0x149c   :  { %1164 = vrot.lane.b32.xlu0 %v1822_v32, %s1894_s1 }
0x14f5   :  { %v1163_v30 = vpop.permute.xlu2 %1162 }
0x14f6   :  { %v1168_v26 = vmul.f32 %v1163_v30, %v1111_v16 }
0x14f8   :  { %v1170_v33 = vpack.c.bf16 %v1168_v26, %v1168_v26 }
0x14fa   :  { %v1174_v36 = vunpack.c.l.b16 %v1170_v33 }
0x14fc   :  { %v1176_v39 = vrot.slane %v1174_v36, 3 }
0x150e   :  { %v1165_v34 = vpop.permute.xlu0 %1164 }
0x150f   :  { %v1169_v35 = vmul.f32 %v1165_v34, %v1126_v17 }
0x1511   :  { %v1171_v37 = vpack.c.bf16 %v1169_v35, %v1169_v35 }
0x1513   :  { %v1175_v38 = vunpack.c.l.b16 %v1171_v37 }
0x1515   :  { %v1177_v40 = vrot.slane %v1175_v38, 2 }
0x1517   :  { %v1178_v41 = vsel %vm701_vm14, %v1177_v40, %v1176_v39 }
0x1518   :  { %v1179_v42 = vpack.c.b16 %v1178_v41, %v1178_v41 }
0x151a   :  { %1180 = vrot.lane.b32.xlu1 %v1179_v42, %s1897_s3 }
0x158c   :  { %v1181_v43 = vpop.permute.xlu1 %1180 }
0x158d   :  { %1679 = vmatmul.msk.bf16.vlgmr.msrb.gmra.mxu1 %vm161_vm7, %v1181_v43 }
0x160a   :  { %v1194_v46 = vpop.f32.mrf.mxu1 }
0x160b   :  { %v1199_v47 = vrot.slane %v1194_v46, 6  ;;  %v1200_v48 = vrot.slane %v1194_v46, 7 }
0x160d   :  { %1203 = vrot.lane.b32.xlu0 %v1200_v48, %s1895_s23  ;;  %1201 = vrot.lane.b32.xlu2 %v1199_v47, %s1895_s23 }
0x1612   :  { %v1196_v49 = vpop.f32.mrf.mxu1 }
0x1667   :  { %v1202_v51 = vpop.permute.xlu2 %1201 }
0x1668   :  { %v1207_v52 = vadd.f32 %v1202_v51, %v2105_v44 }
0x166a   :  { %1823 = vtanh.f32 %v1207_v52  ;;  %v1680_v56 = vmul.f32 -1.442695, %v1207_v52 }
0x1670   :  { %v1824_v45 = vpop.eup %1823 }
0x1671   :  { %1259 = vrot.lane.b32.xlu1 %v1824_v45, %s1893_s18 }
0x167f   :  { %v1204_v53 = vpop.permute.xlu0 %1203 }
0x1680   :  { %v1208_v54 = vadd.f32 %v1204_v53, %v2108_v50 }
0x1682   :  { %1825 = vtanh.f32 %v1208_v54  ;;  %v1681_v57 = vmul.f32 -1.442695, %v1208_v54 }
0x1683   :  { %1827 = vpow2.f32 %v1680_v56 }
0x1684   :  { %1829 = vpow2.f32 %v1681_v57 }
0x1688   :  { %v1826_v55 = vpop.eup %1825 }
0x1689   :  { %1261 = vrot.lane.b32.xlu2 %v1826_v55, %s1893_s18  ;;  %v1828_v58 = vpop.eup %1827 }
0x168a   :  { %v1830_v59 = vpop.eup %1829  ;;  %v1215_v60 = vadd.f32 1.0, %v1828_v58 }
0x168b   :  { %v1216_v0 = vadd.f32 1.0, %v1830_v59 }
0x168c   :  { %1831 = vrcp.f32 %v1215_v60  ;;  %vm1222_vm5 = vweird.f32 %v1215_v60  ;;  %v1228_v8 = vand.u32 2147483648, %v1215_v60  ;;  %v1226_v10 = vand.u32 2147483647, %v1215_v60 }
0x168d   :  { %1833 = vrcp.f32 %v1216_v0  ;;  %v1243_v9 = vand.u32 2147483648, %v1216_v0  ;;  %vm1237_vm8 = vweird.f32 %v1216_v0  ;;  %v1241_v11 = vand.u32 2147483647, %v1216_v0 }
0x168e   :  { %v1229_v14 = vor.u32 1.1754944e-38, %v1228_v8  ;;  %vm1227_vm10 = vcmp.eq.f32.partialorder %v1226_v10, 8.507059e+37 }
0x168f   :  { %v1244_v15 = vor.u32 1.1754944e-38, %v1243_v9  ;;  %vm1242_vm11 = vcmp.eq.f32.partialorder %v1241_v11, 8.507059e+37 }
0x1692   :  { %v1832_v61 = vpop.eup %1831 }
0x1693   :  { %v1834_v62 = vpop.eup %1833  ;;  %v1218_v63 = vmul.f32 %v1832_v61, %v1215_v60  ;;  %vm1223_vm3 = vweird.f32 %v1832_v61 }
0x1694   :  { %v1233_v1 = vmul.f32 %v1834_v62, %v1216_v0  ;;  %vm1238_vm4 = vweird.f32 %v1834_v62  ;;  %vm1224_vm6 = vmor %vm1222_vm5, %vm1223_vm3 }
0x1695   :  { %v1219_v2 = vsub.f32 1.0, %v1218_v63  ;;  %vm1239_vm9 = vmor %vm1237_vm8, %vm1238_vm4 }
0x1696   :  { %v1234_v3 = vsub.f32 1.0, %v1233_v1 }
0x1697   :  { %v1220_v4 = vmul.f32 %v1832_v61, %v1219_v2 }
0x1698   :  { %v1235_v5 = vmul.f32 %v1834_v62, %v1234_v3 }
0x1699   :  { %v1221_v6 = vadd.f32 %v1832_v61, %v1220_v4 }
0x169a   :  { %v1236_v7 = vadd.f32 %v1834_v62, %v1235_v5 }
0x169b   :  { %v1225_v12 = vsel %vm1224_vm6, %v1832_v61, %v1221_v6 }
0x169c   :  { %v1240_v13 = vsel %vm1239_vm9, %v1834_v62, %v1236_v7  ;;  %v1230_v17 = vsel %vm1227_vm10, %v1229_v14, %v1225_v12 }
0x169d   :  { %v1245_v18 = vsel %vm1242_vm11, %v1244_v15, %v1240_v13  ;;  %v1255_v28 = vmul.f32 %v1251_v19, %v1230_v17 }
0x169e   :  { %v1256_v25 = vmul.f32 %v1252_v24, %v1245_v18 }
0x16e3   :  { %v1260_v16 = vpop.permute.xlu1 %1259  ;;  %v1262_v20 = vpop.permute.xlu2 %1261 }
0x16e4   :  { %v1265_v21 = vmul.f32 %v1260_v16, %v1230_v17  ;;  %v1266_v23 = vmul.f32 %v1262_v20, %v1245_v18 }
0x16e6   :  { %1269 = vrot.lane.b32.xlu0 %v1265_v21, %s1897_s3  ;;  %1271 = vrot.lane.b32.xlu1 %v1266_v23, %s1897_s3 }
0x1758   :  { %v1270_v27 = vpop.permute.xlu0 %1269  ;;  %v1272_v22 = vpop.permute.xlu1 %1271 }
0x1759   :  { %v2220_v32 = vadd.f32 %v1270_v27, %v1255_v28  ;;  %v2222_v30 = vadd.f32 %v1272_v22, %v1256_v25 }
0x175b   :  { %1835 = vtanh.f32 %v2220_v32  ;;  %v1370_v19 = vrot.slane %v2222_v30, 1  ;;  %v1369_v24 = vrot.slane %v2220_v32, 1 }
0x175c   :  { %1837 = vtanh.f32 %v2222_v30 }
0x1761   :  { %v1836_v26 = vpop.eup %1835 }
0x1762   :  { %v1838_v33 = vpop.eup %1837  ;;  %1281 = vrot.lane.b32.xlu2 %v1836_v26, %s1894_s1 }
0x1763   :  { %1283 = vrot.lane.b32.xlu0 %v1838_v33, %s1894_s1 }
0x17bc   :  { %v1282_v31 = vpop.permute.xlu2 %1281 }
0x17bd   :  { %v1287_v29 = vmul.f32 %v1282_v31, %v1230_v17 }
0x17bf   :  { %v1289_v34 = vpack.c.bf16 %v1287_v29, %v1287_v29 }
0x17c1   :  { %v1293_v37 = vunpack.c.l.b16 %v1289_v34 }
0x17c3   :  { %v1295_v40 = vrot.slane %v1293_v37, 2 }
0x17d5   :  { %v1284_v35 = vpop.permute.xlu0 %1283 }
0x17d6   :  { %v1288_v36 = vmul.f32 %v1284_v35, %v1245_v18 }
0x17d8   :  { %v1290_v38 = vpack.c.bf16 %v1288_v36, %v1288_v36 }
0x17da   :  { %v1294_v39 = vunpack.c.l.b16 %v1290_v38 }
0x17dc   :  { %v1296_v41 = vrot.slane %v1294_v39, 1 }
0x17de   :  { %v1297_v42 = vsel %vm701_vm14, %v1296_v41, %v1295_v40 }
0x17df   :  { %v1298_v43 = vpack.c.b16 %v1297_v42, %v1297_v42 }
0x17e1   :  { %1299 = vrot.lane.b32.xlu1 %v1298_v43, %s1897_s3 }
0x1853   :  { %v1300_v46 = vpop.permute.xlu1 %1299 }
0x1854   :  { %1682 = vmatmul.msk.bf16.vlgmr.msrb.gmra.mxu2 %vm161_vm7, %v1300_v46 }
0x18d7   :  { %v1313_v47 = vpop.f32.mrf.mxu2 }
0x18d8   :  { %v1318_v48 = vrot.slane %v1313_v47, 7  ;;  %1321 = vrot.lane.b32.xlu0 %v1313_v47, %s1895_s23 }
0x18da   :  { %1319 = vrot.lane.b32.xlu2 %v1318_v48, %s1895_s23 }
0x18df   :  { %v1315_v49 = vpop.f32.mrf.mxu2 }
0x1934   :  { %v1320_v51 = vpop.permute.xlu2 %1319 }
0x1935   :  { %v1325_v52 = vadd.f32 %v1320_v51, %v2105_v44 }
0x1937   :  { %1839 = vtanh.f32 %v1325_v52  ;;  %v1683_v57 = vmul.f32 -1.442695, %v1325_v52 }
0x193d   :  { %v1840_v45 = vpop.eup %1839 }
0x193e   :  { %1377 = vrot.lane.b32.xlu1 %v1840_v45, %s1893_s18 }
0x194a   :  { %v1322_v53 = vpop.permute.xlu0 %1321 }
0x194b   :  { %v1326_v54 = vadd.f32 %v1322_v53, %v2108_v50 }
0x194d   :  { %1841 = vtanh.f32 %v1326_v54  ;;  %v1684_v56 = vmul.f32 -1.442695, %v1326_v54 }
0x194f   :  { %1843 = vpow2.f32 %v1684_v56 }
0x1950   :  { %1845 = vpow2.f32 %v1683_v57 }
0x1953   :  { %v1842_v55 = vpop.eup %1841 }
0x1954   :  { %1379 = vrot.lane.b32.xlu2 %v1842_v55, %s1893_s18 }
0x1955   :  { %v1844_v58 = vpop.eup %1843 }
0x1956   :  { %v1846_v59 = vpop.eup %1845  ;;  %v1334_v60 = vadd.f32 1.0, %v1844_v58  ;;  %v1660_v58 = vmul.f32 -1.442695, %v2108_v50 }
0x1957   :  { %v1333_v0 = vadd.f32 1.0, %v1846_v59 }
0x1958   :  { %1847 = vrcp.f32 %v1334_v60  ;;  %v1361_v7 = vand.u32 2147483648, %v1334_v60  ;;  %vm1355_vm13 = vweird.f32 %v1334_v60  ;;  %v1359_v8 = vand.u32 2147483647, %v1334_v60 }
0x1959   :  { %1849 = vrcp.f32 %v1333_v0  ;;  %v1346_v10 = vand.u32 2147483648, %v1333_v0  ;;  %vm1340_vm1 = vweird.f32 %v1333_v0  ;;  %v1344_v12 = vand.u32 2147483647, %v1333_v0 }
0x195a   :  { %v1362_v13 = vor.u32 1.1754944e-38, %v1361_v7  ;;  %vm1360_vm3 = vcmp.eq.f32.partialorder %v1359_v8, 8.507059e+37 }
0x195b   :  { %v1347_v17 = vor.u32 1.1754944e-38, %v1346_v10  ;;  %vm1345_vm4 = vcmp.eq.f32.partialorder %v1344_v12, 8.507059e+37 }
0x195e   :  { %v1848_v61 = vpop.eup %1847 }
0x195f   :  { %v1850_v62 = vpop.eup %1849  ;;  %v1351_v63 = vmul.f32 %v1848_v61, %v1334_v60  ;;  %vm1356_vm12 = vweird.f32 %v1848_v61  ;;  %v1659_v60 = vmul.f32 -1.442695, %v2105_v44 }
0x1960   :  { %v1336_v1 = vmul.f32 %v1850_v62, %v1333_v0  ;;  %vm1341_vm15 = vweird.f32 %v1850_v62  ;;  %vm1357_vm0 = vmor %vm1355_vm13, %vm1356_vm12 }
0x1961   :  { %v1352_v2 = vsub.f32 1.0, %v1351_v63  ;;  %vm1342_vm2 = vmor %vm1340_vm1, %vm1341_vm15 }
0x1962   :  { %v1337_v3 = vsub.f32 1.0, %v1336_v1 }
0x1963   :  { %v1353_v4 = vmul.f32 %v1848_v61, %v1352_v2 }
0x1964   :  { %v1338_v5 = vmul.f32 %v1850_v62, %v1337_v3 }
0x1965   :  { %v1354_v6 = vadd.f32 %v1848_v61, %v1353_v4 }
0x1966   :  { %v1339_v9 = vadd.f32 %v1850_v62, %v1338_v5 }
0x1967   :  { %v1358_v11 = vsel %vm1357_vm0, %v1848_v61, %v1354_v6 }
0x1968   :  { %v1343_v14 = vsel %vm1342_vm2, %v1850_v62, %v1339_v9  ;;  %v1363_v15 = vsel %vm1360_vm3, %v1362_v13, %v1358_v11 }
0x1969   :  { %v1348_v21 = vsel %vm1345_vm4, %v1347_v17, %v1343_v14  ;;  %v1374_v28 = vmul.f32 %v1370_v19, %v1363_v15 }
0x196a   :  { %v1373_v22 = vmul.f32 %v1369_v24, %v1348_v21 }
0x19ae   :  { %v1380_v16 = vpop.permute.xlu2 %1379 }
0x19af   :  { %v1384_v18 = vmul.f32 %v1380_v16, %v1363_v15 }
0x19b0   :  { %v1378_v20 = vpop.permute.xlu1 %1377 }
0x19b1   :  { %v1383_v23 = vmul.f32 %v1378_v20, %v1348_v21  ;;  %1389 = vrot.lane.b32.xlu1 %v1384_v18, %s1897_s3 }
0x19b3   :  { %1387 = vrot.lane.b32.xlu0 %v1383_v23, %s1897_s3 }
0x1a23   :  { %v1390_v25 = vpop.permute.xlu1 %1389 }
0x1a24   :  { %v2241_v27 = vadd.f32 %v1390_v25, %v1374_v28 }
0x1a25   :  { %v1388_v26 = vpop.permute.xlu0 %1387 }
0x1a26   :  { %1851 = vtanh.f32 %v2241_v27  ;;  %v2244_v33 = vadd.f32 %v1388_v26, %v1373_v22 }
0x1a28   :  { %1853 = vtanh.f32 %v2244_v33 }
0x1a29   :  { %1855 = vtanh.f32 %v2108_v50 }
0x1a2c   :  { %v1852_v31 = vpop.eup %1851 }
0x1a2d   :  { %1401 = vrot.lane.b32.xlu0 %v1852_v31, %s1894_s1 }
0x1a2e   :  { %v1854_v29 = vpop.eup %1853 }
0x1a2f   :  { %1399 = vrot.lane.b32.xlu2 %v1854_v29, %s1894_s1  ;;  %v1856_v48 = vpop.eup %1855 }
0x1a89   :  { %v1400_v30 = vpop.permute.xlu2 %1399 }
0x1a8a   :  { %v1405_v32 = vmul.f32 %v1400_v30, %v1348_v21 }
0x1a8c   :  { %v1407_v34 = vpack.c.bf16 %v1405_v32, %v1405_v32 }
0x1a8e   :  { %v1411_v36 = vunpack.c.l.b16 %v1407_v34 }
0x1a90   :  { %v1413_v39 = vrot.slane %v1411_v36, 1 }
0x1a9f   :  { %v1402_v35 = vpop.permute.xlu0 %1401 }
0x1aa0   :  { %v1406_v37 = vmul.f32 %v1402_v35, %v1363_v15 }
0x1aa2   :  { %v1408_v38 = vpack.c.bf16 %v1406_v37, %v1406_v37 }
0x1aa4   :  { %v1412_v40 = vunpack.c.l.b16 %v1408_v38 }
0x1aa6   :  { %v1414_v41 = vsel %vm701_vm14, %v1412_v40, %v1413_v39 }
0x1aa7   :  { %v1415_v42 = vpack.c.b16 %v1414_v41, %v1414_v41 }
0x1aa9   :  { %1416 = vrot.lane.b32.xlu1 %v1415_v42, %s1897_s3 }
0x1b1b   :  { %v1417_v43 = vpop.permute.xlu1 %1416 }
0x1b1c   :  { %1685 = vmatmul.msk.bf16.vlgmr.msrb.gmra.mxu0 %vm161_vm7, %v1417_v43 }
0x1b99   :  { %v1430_v46 = vpop.f32.mrf.mxu0 }
0x1b9a   :  { %v1435_v47 = vrot.slane %v1430_v46, 1  ;;  %1436 = vrot.lane.b32.xlu0 %v1430_v46, %s1895_s23 }
0x1b9c   :  { %1438 = vrot.lane.b32.xlu2 %v1435_v47, %s1895_s23 }
0x1ba1   :  { %v1432_v49 = vpop.f32.mrf.mxu0 }
0x1ba2   :  { %566 = vrot.lane.b32.xlu0 %v1856_v48, %s1893_s18 }
0x1bf6   :  { %v1439_v51 = vpop.permute.xlu2 %1438 }
0x1bf7   :  { %v1443_v52 = vadd.f32 %v1439_v51, %v2108_v50 }
0x1bf9   :  { %1857 = vtanh.f32 %v1443_v52  ;;  %v1687_v59 = vmul.f32 -1.442695, %v1443_v52 }
0x1bff   :  { %v1858_v45 = vpop.eup %1857 }
0x1c00   :  { %1496 = vrot.lane.b32.xlu1 %v1858_v45, %s1893_s18 }
0x1c0c   :  { %v1437_v53 = vpop.permute.xlu0 %1436 }
0x1c0d   :  { %v1442_v54 = vadd.f32 %v1437_v53, %v2105_v44 }
0x1c0f   :  { %1859 = vtanh.f32 %v1442_v54  ;;  %v1686_v57 = vmul.f32 -1.442695, %v1442_v54 }
0x1c10   :  { %1861 = vtanh.f32 %v2105_v44 }
0x1c11   :  { %1863 = vpow2.f32 %v1686_v57 }
0x1c12   :  { %1865 = vpow2.f32 %v1660_v58 }
0x1c13   :  { %1867 = vpow2.f32 %v1687_v59 }
0x1c14   :  { %1869 = vpow2.f32 %v1659_v60  ;;  %v567_v37 = vpop.permute.xlu0 %566  ;;  %v1486_v60 = vrot.slane %v2244_v33, 1  ;;  %v1719_v33 = vld [vmem:[%s2309_s5 + $0x3] ss:$0 sm:$0xff] }
0x1c15   :  { %v1860_v55 = vpop.eup %1859 }
0x1c16   :  { %1494 = vrot.lane.b32.xlu2 %v1860_v55, %s1893_s18  ;;  %v1862_v56 = vpop.eup %1861 }
0x1c17   :  { %v1864_v0 = vpop.eup %1863 }
0x1c18   :  { %v1866_v61 = vpop.eup %1865  ;;  %v1450_v63 = vadd.f32 1.0, %v1864_v0  ;;  %v1487_v0 = vrot.slane %v2241_v27, 1 }
0x1c19   :  { %v1868_v62 = vpop.eup %1867  ;;  %v529_v1 = vadd.f32 1.0, %v1866_v61 }
0x1c1a   :  { %v1451_v2 = vadd.f32 1.0, %v1868_v62  ;;  %1871 = vrcp.f32 %v1450_v63  ;;  %v1870_v3 = vpop.eup %1869  ;;  %v1463_v23 = vand.u32 2147483648, %v1450_v63  ;;  %vm1457_vm6 = vweird.f32 %v1450_v63 }
0x1c1b   :  { %1873 = vrcp.f32 %v529_v1  ;;  %v2264_v4 = vadd.f32 1.0, %v1870_v3  ;;  %v556_v21 = vand.u32 2147483648, %v529_v1  ;;  %v1461_v19 = vand.u32 2147483647, %v1450_v63 }
0x1c1c   :  { %1875 = vrcp.f32 %v1451_v2  ;;  %vm550_vm9 = vweird.f32 %v529_v1  ;;  %v554_v28 = vand.u32 2147483647, %v529_v1  ;;  %v1478_v22 = vand.u32 2147483648, %v1451_v2 }
0x1c1d   :  { %1877 = vrcp.f32 %v2264_v4  ;;  %vm1472_vm12 = vweird.f32 %v1451_v2  ;;  %v1476_v29 = vand.u32 2147483647, %v1451_v2  ;;  %v1464_v34 = vor.u32 1.1754944e-38, %v1463_v23 }
0x1c1e   :  { %564 = vrot.lane.b32.xlu2 %v1862_v56, %s1893_s18  ;;  %v557_v36 = vor.u32 1.1754944e-38, %v556_v21  ;;  %vm1462_vm15 = vcmp.eq.f32.partialorder %v1461_v19, 8.507059e+37  ;;  %vm555_vm0 = vcmp.eq.f32.partialorder %v554_v28, 8.507059e+37  ;;  %v1479_v41 = vor.u32 1.1754944e-38, %v1478_v22  ;;  %s1898_s18 = smov 48  }
0x1c1f   :  { %vm1477_vm2 = vcmp.eq.f32.partialorder %v1476_v29, 8.507059e+37  ;;  %v541_v51 = vand.u32 2147483648, %v2264_v4  ;;  %vm535_vm3 = vweird.f32 %v2264_v4  ;;  %v539_v45 = vand.u32 2147483647, %v2264_v4  ;;  %v1720_v28 = vld [vmem:[%s2309_s5 + $0x4] ss:$0 sm:$0xff] }
0x1c20   :  { %v1872_v50 = vpop.eup %1871 }
0x1c21   :  { %v1874_v5 = vpop.eup %1873  ;;  %v1453_v7 = vmul.f32 %v1872_v50, %v1450_v63  ;;  %vm1458_vm7 = vweird.f32 %v1872_v50  ;;  %v542_v54 = vor.u32 1.1754944e-38, %v541_v51 }
0x1c22   :  { %v1876_v6 = vpop.eup %1875  ;;  %v546_v44 = vmul.f32 %v1874_v5, %v529_v1  ;;  %vm551_vm5 = vweird.f32 %v1874_v5  ;;  %vm2268_vm10 = vmor %vm1457_vm6, %vm1458_vm7  ;;  %vm540_vm7 = vcmp.eq.f32.partialorder %v539_v45, 8.507059e+37 }
0x1c23   :  { %v1468_v8 = vmul.f32 %v1876_v6, %v1451_v2  ;;  %v1454_v9 = vsub.f32 1.0, %v1453_v7  ;;  %v1878_v10 = vpop.eup %1877  ;;  %vm1473_vm8 = vweird.f32 %v1876_v6  ;;  %vm2272_vm11 = vmor %vm550_vm9, %vm551_vm5  ;;  %vm1539_vm5 = vcmask 123904  }
0x1c24   :  { %v547_v11 = vsub.f32 1.0, %v546_v44  ;;  %v531_v14 = vmul.f32 %v1878_v10, %v2264_v4  ;;  %vm2280_vm13 = vmor %vm1472_vm12, %vm1473_vm8  ;;  %vm536_vm1 = vweird.f32 %v1878_v10  ;;  %vm1581_vm8 = vcmask 1024  }
0x1c25   :  { %v1469_v12 = vsub.f32 1.0, %v1468_v8  ;;  %v1455_v13 = vmul.f32 %v1872_v50, %v1454_v9  ;;  %vm537_vm4 = vmor %vm535_vm3, %vm536_vm1 }
0x1c26   :  { %v548_v15 = vmul.f32 %v1874_v5, %v547_v11  ;;  %v532_v18 = vsub.f32 1.0, %v531_v14 }
0x1c27   :  { %v1470_v16 = vmul.f32 %v1876_v6, %v1469_v12  ;;  %v1456_v17 = vadd.f32 %v1872_v50, %v1455_v13 }
0x1c28   :  { %v549_v20 = vadd.f32 %v1874_v5, %v548_v15  ;;  %v533_v30 = vmul.f32 %v1878_v10, %v532_v18 }
0x1c29   :  { %v1471_v24 = vadd.f32 %v1876_v6, %v1470_v16  ;;  %v1460_v31 = vsel %vm2268_vm10, %v1872_v50, %v1456_v17 }
0x1c2a   :  { %v553_v32 = vsel %vm2272_vm11, %v1874_v5, %v549_v20  ;;  %v1465_v39 = vsel %vm1462_vm15, %v1464_v34, %v1460_v31  ;;  %v534_v46 = vadd.f32 %v1878_v10, %v533_v30 }
0x1c2b   :  { %v1475_v38 = vsel %vm2280_vm13, %v1876_v6, %v1471_v24  ;;  %v558_v42 = vsel %vm555_vm0, %v557_v36, %v553_v32  ;;  %v1490_v61 = vmul.f32 %v1486_v60, %v1465_v39 }
0x1c2c   :  { %v571_v47 = vmul.f32 %v567_v37, %v558_v42  ;;  %v1480_v49 = vsel %vm1477_vm2, %v1479_v41, %v1475_v38  ;;  %v538_v53 = vsel %vm537_vm4, %v1878_v10, %v534_v46 }
0x1c2d   :  { %v543_v56 = vsel %vm540_vm7, %v542_v54, %v538_v53  ;;  %v1491_v1 = vmul.f32 %v1487_v0, %v1480_v49 }
0x1c2e   :  { %1879 = vtanh.f32 %v571_v47 }
0x1c34   :  { %v1880_v58 = vpop.eup %1879 }
0x1c70   :  { %v1495_v40 = vpop.permute.xlu2 %1494 }
0x1c71   :  { %v1500_v43 = vmul.f32 %v1495_v40, %v1465_v39 }
0x1c72   :  { %v1497_v48 = vpop.permute.xlu1 %1496 }
0x1c73   :  { %v1501_v52 = vmul.f32 %v1497_v48, %v1480_v49  ;;  %1504 = vrot.lane.b32.xlu0 %v1500_v43, %s1897_s3 }
0x1c75   :  { %1506 = vrot.lane.b32.xlu1 %v1501_v52, %s1897_s3 }
0x1c78   :  { %v565_v55 = vpop.permute.xlu2 %564 }
0x1c79   :  { %v570_v57 = vmul.f32 %v565_v55, %v543_v56 }
0x1c7b   :  { %1881 = vtanh.f32 %v570_v57 }
0x1c7d   :  { %578 = vrot.lane.b32.xlu1 %v1880_v58, %s1898_s18 }
0x1c81   :  { %v1882_v59 = vpop.eup %1881 }
0x1c82   :  { %576 = vrot.lane.b32.xlu0 %v1882_v59, %s1898_s18 }
0x1ce5   :  { %v1505_v62 = vpop.permute.xlu0 %1504 }
0x1ce6   :  { %v1510_v63 = vadd.f32 %v1505_v62, %v1490_v61 }
0x1ce7   :  { %v1507_v2 = vpop.permute.xlu1 %1506 }
0x1ce8   :  { %1883 = vtanh.f32 %v1510_v63  ;;  %v1511_v3 = vadd.f32 %v1507_v2, %v1491_v1 }
0x1cea   :  { %1885 = vtanh.f32 %v1511_v3 }
0x1cee   :  { %v1884_v4 = vpop.eup %1883 }
0x1cef   :  { %1516 = vrot.lane.b32.xlu1 %v1884_v4, %s1894_s1  ;;  %v579_v5 = vpop.permute.xlu1 %578 }
0x1cf0   :  { %v1886_v50 = vpop.eup %1885  ;;  %v583_v7 = vmul.f32 %v579_v5, %v558_v42 }
0x1cf1   :  { %1518 = vrot.lane.b32.xlu2 %v1886_v50, %s1894_s1 }
0x1cf4   :  { %v577_v6 = vpop.permute.xlu0 %576 }
0x1cf5   :  { %v582_v8 = vmul.f32 %v577_v6, %v543_v56 }
0x1cf9   :  { %1527 = vrot.lane.b32.xlu2 %v1719_v33, %s1899_s15 }
0x1d4b   :  { %v1519_v27 = vpop.permute.xlu2 %1518 }
0x1d4c   :  { %v1523_v13 = vmul.f32 %v1519_v27, %v1480_v49 }
0x1d4e   :  { %v1545_v14 = vmul.f32 %v1719_v33, %v1523_v13 }
0x1d50   :  { %v1548_v17 = vrot.slane %v1545_v14, 7 }
0x1d53   :  { %v1528_v44 = vpop.permute.xlu2 %1527 }
0x1d54   :  { %v1531_v9 = vmul.f32 %v1528_v44, %v583_v7  ;;  %v1530_v10 = vmul.f32 %v1528_v44, %v582_v8 }
0x1d56   :  { %v1534_v11 = vrot.slane %v1531_v9, 7 }
0x1d58   :  { %v1535_v12 = vsel %vm701_vm14, %v1534_v11, %v1530_v10 }
0x1d59   :  { %1536 = vrot.lane.b32.xlu0 %v1535_v12, %s1899_s15 }
0x1d61   :  { %v1517_v15 = vpop.permute.xlu1 %1516 }
0x1d62   :  { %v1522_v16 = vmul.f32 %v1517_v15, %v1465_v39 }
0x1d64   :  { %v1544_v18 = vmul.f32 %v1719_v33, %v1522_v16 }
0x1d66   :  { %v1549_v20 = vsel %vm701_vm14, %v1548_v17, %v1544_v18 }
0x1d67   :  { %1550 = vrot.lane.b32.xlu1 %v1549_v20, %s1897_s3 }
0x1dcb   :  { %v1537_v21 = vpop.permute.xlu0 %1536 }
0x1dcc   :  { %v1540_v23 = vsel %vm1539_vm5, %v1537_v21, 0.0 }
0x1dcd   :  { %1541 = vadd.xlane.f32.xlu2 %v1540_v23 }
0x1dd9   :  { %v1551_v19 = vpop.permute.xlu1 %1550 }
0x1dda   :  { %v1553_v24 = vsel %vm1539_vm5, %v1551_v19, 0.0 }
0x1ddb   :  { %1554 = vadd.xlane.f32.xlu0 %v1553_v24 }
0x1e40   :  { %v1542_v25 = vpop.xlane.xlu2 %1541 }
0x1e4e   :  { %v1555_v22 = vpop.xlane.xlu0 %1554 }
0x1e4f   :  { %v1556_v26 = vadd.f32 %v1555_v22, %v1542_v25 }
0x1e51   :  { %v1561_v31 = vadd.f32 %v1720_v28, %v1556_v26 }
0x1e53   :  { %v1688_v29 = vmul.f32 -1.442695, %v1561_v31 }
0x1e55   :  { %1887 = vpow2.f32 %v1688_v29 }
0x1e5b   :  { %v1888_v30 = vpop.eup %1887 }
0x1e5c   :  { %v1565_v32 = vadd.f32 1.0, %v1888_v30 }
0x1e5e   :  { %1889 = vrcp.f32 %v1565_v32  ;;  %v1577_v37 = vand.u32 2147483648, %v1565_v32  ;;  %v1575_v39 = vand.u32 2147483647, %v1565_v32  ;;  %vm1571_vm6 = vweird.f32 %v1565_v32 }
0x1e60   :  { %v1578_v41 = vor.u32 1.1754944e-38, %v1577_v37  ;;  %vm1576_vm10 = vcmp.eq.f32.partialorder %v1575_v39, 8.507059e+37 }
0x1e64   :  { %v1890_v34 = vpop.eup %1889 }
0x1e65   :  { %v1567_v35 = vmul.f32 %v1890_v34, %v1565_v32  ;;  %vm1572_vm14 = vweird.f32 %v1890_v34 }
0x1e66   :  { %vm1573_vm9 = vmor %vm1571_vm6, %vm1572_vm14 }
0x1e67   :  { %v1568_v36 = vsub.f32 1.0, %v1567_v35 }
0x1e69   :  { %v1569_v38 = vmul.f32 %v1890_v34, %v1568_v36 }
0x1e6b   :  { %v1570_v40 = vadd.f32 %v1890_v34, %v1569_v38 }
0x1e6d   :  { %v1574_v42 = vsel %vm1573_vm9, %v1890_v34, %v1570_v40 }
0x1e6e   :  { %v1579_v43 = vsel %vm1576_vm10, %v1578_v41, %v1574_v42 }
0x1e6f   :  { %1582 = vst.msk [vmem:[%s2313_s6] sm:$0x3] %vm1581_vm8, %v1579_v43 }

</bundles_post_ra>
